<compile_context>
chip_gen: v5e
topology: v5e:2x2
jax: 0.10.0
libtpu: 0.0.40
codegen_flags: <defaults>
</compile_context>

<pallas_src>
import functools

import jax
import jax.numpy as jnp
from jax.experimental import pallas as pl
from jax.experimental.pallas import tpu as pltpu


def rgcn_kernel(adj_ref, x_ref, invdeg_ref, w_ref, xtile_ref, wloop_ref, bias_ref,
                out_ref, acc_ref, *, num_rels):
    r = pl.program_id(1)

    # Initialize the accumulator with the self-loop contribution (avoids a zero-fill
    # store pass and a full-tile add in the epilogue).
    @pl.when(r == 0)
    def _():
        acc_ref[...] = jnp.dot(xtile_ref[...], wloop_ref[...],
                               preferred_element_type=jnp.float32)

    # Message passing for relation r: (TN, N) @ (N, F_in) -> (TN, F_in)  (bf16 MXU, f32 acc)
    agg = jnp.dot(adj_ref[...], x_ref[...], preferred_element_type=jnp.float32)
    # GraphConv(norm='right'): scale by 1/in-degree of the destination node, applied
    # post-matmul in f32 (cheap VPU multiply, broadcast over lanes).
    agg = agg * invdeg_ref[...]
    # Relation-specific transform: (TN, F_in) @ (F_in, F_out) -> (TN, F_out)  (f32 MXU)
    acc_ref[...] += jnp.dot(agg, w_ref[...], preferred_element_type=jnp.float32)

    # Fused epilogue on the last relation step: bias + ReLU, single lane-dense write.
    @pl.when(r == num_rels - 1)
    def _():
        h = acc_ref[...] + bias_ref[...]                       # (1, F_out) broadcasts over rows
        out_ref[...] = jnp.maximum(h, 0.0).astype(out_ref.dtype)
        # TODO(synk): dropout with p > 0 would need pltpu.prng_seed/prng_random_bits;
        # the module default p = 0.0 is the identity, so nothing is emitted here.


def _round_up(a, b):
    return ((a + b - 1) // b) * b


def rel_graph_conv_forward(adj, x, rel_weight, loop_weight, h_bias, *, tile_n=256):
    """adj: [R, N, N] dense 0/1 adjacency (rows = destination nodes), x: [N, F_in],
    rel_weight: [R, F_in, F_out], loop_weight: [F_in, F_out], h_bias: [F_out]."""
    R, N, _ = adj.shape
    F_in = x.shape[1]
    F_out = rel_weight.shape[2]
    assert F_in % 128 == 0 and F_out % 128 == 0, "feature dims must be lane-aligned (128)"

    tile_n = min(tile_n, _round_up(N, 128))
    n_pad = _round_up(N, tile_n) - N
    N_pad = N + n_pad

    # norm='right': 1 / in-degree (clamped to 1), computed once in f32 from the raw 0/1 adjacency.
    inv_deg = 1.0 / jnp.maximum(jnp.sum(adj.astype(jnp.float32), axis=-1, keepdims=True), 1.0)

    if n_pad:
        adj = jnp.pad(adj, ((0, 0), (0, n_pad), (0, n_pad)))
        x = jnp.pad(x, ((0, n_pad), (0, 0)))
        inv_deg = jnp.pad(inv_deg, ((0, 0), (0, n_pad), (0, 0)), constant_values=1.0)

    adj_bf16 = adj.astype(jnp.bfloat16)          # 0/1 is exact in bf16 -> halves the dominant HBM stream
    x_bf16 = x.astype(jnp.bfloat16)              # full X, resident, message-passing operand
    x_f32 = x.astype(jnp.float32)                # per-tile X for the self-loop (full precision)
    rel_weight = rel_weight.astype(jnp.float32)
    loop_weight = loop_weight.astype(jnp.float32)
    bias2 = h_bias.reshape(1, F_out).astype(jnp.float32)

    grid = (N_pad // tile_n, R)

    # Rough resident-VMEM estimate (double-buffered blocks + acc + out) with headroom.
    needed = (2 * tile_n * N_pad * 2            # adj tile (bf16)
              + 2 * N_pad * F_in * 2            # full X (bf16)
              + 2 * tile_n * 1 * 4              # inv_deg tile
              + 2 * F_in * F_out * 4            # W_r
              + 2 * tile_n * F_in * 4           # X tile (f32)
              + 2 * F_in * F_out * 4            # loop weight
              + 2 * F_out * 4                   # bias
              + 3 * tile_n * F_out * 4)         # out (x2) + acc scratch
    vmem_limit = int(min(max(2 * needed, 32 * 1024 * 1024), 100 * 1024 * 1024))

    kernel = functools.partial(rgcn_kernel, num_rels=R)

    out = pl.pallas_call(
        kernel,
        out_shape=jax.ShapeDtypeStruct((N_pad, F_out), jnp.float32),
        grid_spec=pltpu.PrefetchScalarGridSpec(
            num_scalar_prefetch=0,
            grid=grid,
            in_specs=[
                pl.BlockSpec((None, tile_n, N_pad), lambda i, r: (r, i, 0)),   # adj tile (bf16)
                pl.BlockSpec((N_pad, F_in), lambda i, r: (0, 0)),              # full X (bf16), resident
                pl.BlockSpec((None, tile_n, 1), lambda i, r: (r, i, 0)),       # 1/deg tile (f32)
                pl.BlockSpec((None, F_in, F_out), lambda i, r: (r, 0, 0)),     # W_r (f32)
                pl.BlockSpec((tile_n, F_in), lambda i, r: (i, 0)),             # X tile (f32, self-loop)
                pl.BlockSpec((F_in, F_out), lambda i, r: (0, 0)),              # self-loop weight
                pl.BlockSpec((1, F_out), lambda i, r: (0, 0)),                 # bias (lane-dense)
            ],
            out_specs=pl.BlockSpec((tile_n, F_out), lambda i, r: (i, 0)),
            scratch_shapes=[pltpu.VMEM((tile_n, F_out), jnp.float32)],
        ),
        compiler_params=pltpu.CompilerParams(
            dimension_semantics=("parallel", "arbitrary"),
            vmem_limit_bytes=vmem_limit),
    )(adj_bf16, x_bf16, inv_deg, rel_weight, x_f32, loop_weight, bias2)
    # TODO(synk): for very large N on v7x (64 MiB VMEM), add a source-node (K) grid axis so the
    # full X does not need to stay resident; unnecessary at these shapes.
    return out[:N]


def rel_graph_conv_reference(adj, x, rel_weight, loop_weight, h_bias):
    """Pure-JAX reference mirroring the PyTorch forward (single node type)."""
    deg = jnp.maximum(jnp.sum(adj, axis=-1, keepdims=True), 1.0)
    h = jnp.einsum('rds,sf,rfo->do', adj / deg, x, rel_weight,
                   precision=jax.lax.Precision.HIGHEST)
    h = h + jnp.matmul(x, loop_weight, precision=jax.lax.Precision.HIGHEST)
    h = h + h_bias
    return jax.nn.relu(h)


if __name__ == "__main__":
    num_nodes = 384                    # not a multiple of tile_n -> exercises padding/partial tiles
    in_feat = 128
    out_feat = 128
    rel_names = ["writes", "cites", "affiliated_with"]
    num_rels = len(rel_names)
    num_bases = 2                      # num_bases < num_rels -> WeightBasis path

    key = jax.random.PRNGKey(0)
    k_adj, k_x, k_basis, k_coeff, k_loop = jax.random.split(key, 5)

    # Dense 0/1 per-relation adjacency (rows = destination nodes).
    adj = (jax.random.uniform(k_adj, (num_rels, num_nodes, num_nodes)) < 0.05
           ).astype(jnp.float32)
    x = jax.random.normal(k_x, (num_nodes, in_feat), dtype=jnp.float32)

    # WeightBasis: W_r = sum_b coeff[r, b] * basis[b]  (xavier_uniform_, gain('relu')).
    gain = 2.0 ** 0.5
    bound = gain * (6.0 / (in_feat + out_feat)) ** 0.5
    basis = jax.random.uniform(k_basis, (num_bases, in_feat, out_feat),
                               minval=-bound, maxval=bound, dtype=jnp.float32)
    coeff = jax.random.normal(k_coeff, (num_rels, num_bases), dtype=jnp.float32)
    rel_weight = jnp.einsum('rb,bio->rio', coeff, basis)

    loop_weight = jax.random.uniform(k_loop, (in_feat, out_feat),
                                     minval=-bound, maxval=bound, dtype=jnp.float32)
    h_bias = jnp.zeros((out_feat,), dtype=jnp.float32)   # nn.init.zeros_

    out = rel_graph_conv_forward(adj, x, rel_weight, loop_weight, h_bias)
    jax.block_until_ready(out)

    out_ref = rel_graph_conv_reference(adj, x, rel_weight, loop_weight, h_bias)
    assert out.shape == (num_nodes, out_feat)
    # Tolerance accounts for the bf16 message-passing operands (f32 accumulation).
    assert jnp.allclose(out, out_ref, atol=2e-2, rtol=2e-2)

    print("KERNEL_OK")
</pallas_src>

<mosaic_0001>
module attributes {stable_mosaic.version = 11 : i64} {
  func.func @rgcn_kernel(%arg0: i32, %arg1: i32, %arg2: memref<1x256x512xbf16, #tpu.memory_space<vmem>>, %arg3: memref<512x128xbf16, #tpu.memory_space<vmem>>, %arg4: memref<1x256x1xf32, #tpu.memory_space<vmem>>, %arg5: memref<1x128x128xf32, #tpu.memory_space<vmem>>, %arg6: memref<256x128xf32, #tpu.memory_space<vmem>>, %arg7: memref<128x128xf32, #tpu.memory_space<vmem>>, %arg8: memref<1x128xf32, #tpu.memory_space<vmem>>, %arg9: memref<256x128xf32, #tpu.memory_space<vmem>>, %arg10: memref<256x128xf32, #tpu.memory_space<vmem>>) attributes {dimension_semantics = [#tpu.dimension_semantics<parallel>, #tpu.dimension_semantics<arbitrary>], iteration_bounds = array<i64: 2, 3>, scalar_prefetch = 0 : i64, scratch_operands = 1 : i64, tpu.core_type = #tpu.core_type<tc>, window_params = [{transform_indices = @transform_0, window_bounds = array<i64: 1, 256, 512>}, {pipeline_mode = #tpu.pipeline_mode<synchronous>, transform_indices = @transform_1, window_bounds = array<i64: 512, 128>}, {transform_indices = @transform_2, window_bounds = array<i64: 1, 256, 1>}, {transform_indices = @transform_3, window_bounds = array<i64: 1, 128, 128>}, {transform_indices = @transform_4, window_bounds = array<i64: 256, 128>}, {pipeline_mode = #tpu.pipeline_mode<synchronous>, transform_indices = @transform_5, window_bounds = array<i64: 128, 128>}, {pipeline_mode = #tpu.pipeline_mode<synchronous>, transform_indices = @transform_6, window_bounds = array<i64: 1, 128>}, {transform_indices = @transform_7, window_bounds = array<i64: 256, 128>}]} {
    %c0_i32 = arith.constant 0 : i32
    %0 = arith.cmpi eq, %arg1, %c0_i32 : i32
    %1 = arith.extui %0 : i1 to i32
    %c0_i32_0 = arith.constant 0 : i32
    %2 = arith.cmpi ne, %1, %c0_i32_0 : i32
    scf.if %2 {
      %c0_17 = arith.constant 0 : index
      %c0_18 = arith.constant 0 : index
      %20 = vector.load %arg6[%c0_17, %c0_18] : memref<256x128xf32, #tpu.memory_space<vmem>>, vector<256x128xf32>
      %c0_19 = arith.constant 0 : index
      %c0_20 = arith.constant 0 : index
      %21 = vector.load %arg7[%c0_19, %c0_20] : memref<128x128xf32, #tpu.memory_space<vmem>>, vector<128x128xf32>
      %cst_21 = arith.constant dense<0.000000e+00> : vector<256x128xf32>
      %22 = tpu.matmul %20, %21, %cst_21 {dimension_numbers = #tpu.dot_dimension_numbers<[1], [0], [0], [1], [0, 0, 1, 1], [], []>} : vector<256x128xf32>, vector<128x128xf32>, vector<256x128xf32> -> vector<256x128xf32>
      %c0_22 = arith.constant 0 : index
      %c0_23 = arith.constant 0 : index
      %23 = vector.load %arg10[%c0_22, %c0_23] : memref<256x128xf32, #tpu.memory_space<vmem>>, vector<256x128xf32>
      tpu.vector_store %arg10[%c0_22, %c0_23], %22 {strides = array<i32>} : memref<256x128xf32, #tpu.memory_space<vmem>>, vector<256x128xf32>,
    } else {
    }
    %c0 = arith.constant 0 : index
    %c0_1 = arith.constant 0 : index
    %c0_2 = arith.constant 0 : index
    %3 = vector.load %arg2[%c0, %c0_1, %c0_2] : memref<1x256x512xbf16, #tpu.memory_space<vmem>>, vector<1x256x512xbf16>
    %4 = vector.shape_cast %3 : vector<1x256x512xbf16> to vector<256x512xbf16>
    %c0_3 = arith.constant 0 : index
    %c0_4 = arith.constant 0 : index
    %5 = vector.load %arg3[%c0_3, %c0_4] : memref<512x128xbf16, #tpu.memory_space<vmem>>, vector<512x128xbf16>
    %cst = arith.constant dense<0.000000e+00> : vector<256x128xf32>
    %6 = tpu.matmul %4, %5, %cst {dimension_numbers = #tpu.dot_dimension_numbers<[1], [0], [0], [1], [0, 0, 1, 1], [], []>} : vector<256x512xbf16>, vector<512x128xbf16>, vector<256x128xf32> -> vector<256x128xf32>
    %c0_5 = arith.constant 0 : index
    %c0_6 = arith.constant 0 : index
    %c0_7 = arith.constant 0 : index
    %7 = vector.load %arg4[%c0_5, %c0_6, %c0_7] : memref<1x256x1xf32, #tpu.memory_space<vmem>>, vector<1x256x1xf32>
    %8 = vector.shape_cast %7 : vector<1x256x1xf32> to vector<256x1xf32>
    %9 = vector.broadcast %8 : vector<256x1xf32> to vector<256x128xf32>
    %10 = arith.mulf %6, %9 : vector<256x128xf32>
    %c0_8 = arith.constant 0 : index
    %c0_9 = arith.constant 0 : index
    %11 = vector.load %arg10[%c0_8, %c0_9] : memref<256x128xf32, #tpu.memory_space<vmem>>, vector<256x128xf32>
    %c0_10 = arith.constant 0 : index
    %c0_11 = arith.constant 0 : index
    %c0_12 = arith.constant 0 : index
    %12 = vector.load %arg5[%c0_10, %c0_11, %c0_12] : memref<1x128x128xf32, #tpu.memory_space<vmem>>, vector<1x128x128xf32>
    %13 = vector.shape_cast %12 : vector<1x128x128xf32> to vector<128x128xf32>
    %cst_13 = arith.constant dense<0.000000e+00> : vector<256x128xf32>
    %14 = tpu.matmul %10, %13, %cst_13 {dimension_numbers = #tpu.dot_dimension_numbers<[1], [0], [0], [1], [0, 0, 1, 1], [], []>} : vector<256x128xf32>, vector<128x128xf32>, vector<256x128xf32> -> vector<256x128xf32>
    %15 = arith.addf %11, %14 : vector<256x128xf32>
    %c0_14 = arith.constant 0 : index
    %c0_15 = arith.constant 0 : index
    %16 = vector.load %arg10[%c0_14, %c0_15] : memref<256x128xf32, #tpu.memory_space<vmem>>, vector<256x128xf32>
    tpu.vector_store %arg10[%c0_14, %c0_15], %15 {strides = array<i32>} : memref<256x128xf32, #tpu.memory_space<vmem>>, vector<256x128xf32>,
    %c2_i32 = arith.constant 2 : i32
    %17 = arith.cmpi eq, %arg1, %c2_i32 : i32
    %18 = arith.extui %17 : i1 to i32
    %c0_i32_16 = arith.constant 0 : i32
    %19 = arith.cmpi ne, %18, %c0_i32_16 : i32
    scf.if %19 {
      %c0_17 = arith.constant 0 : index
      %c0_18 = arith.constant 0 : index
      %20 = vector.load %arg10[%c0_17, %c0_18] : memref<256x128xf32, #tpu.memory_space<vmem>>, vector<256x128xf32>
      %c0_19 = arith.constant 0 : index
      %c0_20 = arith.constant 0 : index
      %21 = vector.load %arg8[%c0_19, %c0_20] : memref<1x128xf32, #tpu.memory_space<vmem>>, vector<1x128xf32>
      %22 = vector.broadcast %21 : vector<1x128xf32> to vector<256x128xf32>
      %23 = arith.addf %20, %22 : vector<256x128xf32>
      %cst_21 = arith.constant 0.000000e+00 : f32
      %24 = vector.broadcast %cst_21 : f32 to vector<256x128xf32>
      %25 = arith.maximumf %23, %24 : vector<256x128xf32>
      %c0_22 = arith.constant 0 : index
      %c0_23 = arith.constant 0 : index
      %26 = vector.load %arg9[%c0_22, %c0_23] : memref<256x128xf32, #tpu.memory_space<vmem>>, vector<256x128xf32>
      tpu.vector_store %arg9[%c0_22, %c0_23], %25 {strides = array<i32>} : memref<256x128xf32, #tpu.memory_space<vmem>>, vector<256x128xf32>,
    } else {
    }
    return
  }
  func.func @transform_0(%arg0: i32, %arg1: i32) -> (i32, i32, i32) {
    %c0_i32 = arith.constant 0 : i32
    %c0_i32_0 = arith.constant 0 : i32
    return %arg1, %arg0, %c0_i32 : i32, i32, i32
  }
  func.func @transform_1(%arg0: i32, %arg1: i32) -> (i32, i32) {
    %c0_i32 = arith.constant 0 : i32
    %c0_i32_0 = arith.constant 0 : i32
    %c0_i32_1 = arith.constant 0 : i32
    return %c0_i32, %c0_i32_0 : i32, i32
  }
  func.func @transform_2(%arg0: i32, %arg1: i32) -> (i32, i32, i32) {
    %c0_i32 = arith.constant 0 : i32
    %c0_i32_0 = arith.constant 0 : i32
    return %arg1, %arg0, %c0_i32 : i32, i32, i32
  }
  func.func @transform_3(%arg0: i32, %arg1: i32) -> (i32, i32, i32) {
    %c0_i32 = arith.constant 0 : i32
    %c0_i32_0 = arith.constant 0 : i32
    %c0_i32_1 = arith.constant 0 : i32
    return %arg1, %c0_i32, %c0_i32_0 : i32, i32, i32
  }
  func.func @transform_4(%arg0: i32, %arg1: i32) -> (i32, i32) {
    %c0_i32 = arith.constant 0 : i32
    %c0_i32_0 = arith.constant 0 : i32
    return %arg0, %c0_i32 : i32, i32
  }
  func.func @transform_5(%arg0: i32, %arg1: i32) -> (i32, i32) {
    %c0_i32 = arith.constant 0 : i32
    %c0_i32_0 = arith.constant 0 : i32
    %c0_i32_1 = arith.constant 0 : i32
    return %c0_i32, %c0_i32_0 : i32, i32
  }
  func.func @transform_6(%arg0: i32, %arg1: i32) -> (i32, i32) {
    %c0_i32 = arith.constant 0 : i32
    %c0_i32_0 = arith.constant 0 : i32
    %c0_i32_1 = arith.constant 0 : i32
    return %c0_i32, %c0_i32_0 : i32, i32
  }
  func.func @transform_7(%arg0: i32, %arg1: i32) -> (i32, i32) {
    %c0_i32 = arith.constant 0 : i32
    %c0_i32_0 = arith.constant 0 : i32
    return %arg0, %c0_i32 : i32, i32
  }
}

</mosaic_0001>

<bundles_post_ra>
// kernel: tpu_custom_call.1
= control target key start
LH: loop header
LB: loop body
LE: loop exit
PB: predicated region body
PF: predicated region fallthrough
CT: control target
= control target key end

     0   :  { %s4326_s0 = inlined_call_operand.hbm [shape: bf16[3,512,512], index: 0, kind: input, shape index: {}]   ;;  %s4327_s1 = inlined_call_operand.hbm [shape: bf16[512,128], index: 1, kind: input, shape index: {}]   ;;  %s4328_s2 = inlined_call_operand.vmem [shape: f32[3,512,1], index: 2, kind: input, shape index: {}]   ;;  %s4329_s3 = inlined_call_operand.hbm [shape: f32[3,128,128], index: 3, kind: input, shape index: {}]   ;;  %s4330_s4 = inlined_call_operand.hbm [shape: f32[512,128], index: 4, kind: input, shape index: {}]   ;;  %s4331_s5 = inlined_call_operand.hbm [shape: f32[128,128], index: 5, kind: input, shape index: {}]   ;;  %s4332_s6 = inlined_call_operand.hbm [shape: f32[1,128], index: 6, kind: input, shape index: {}]   ;;  %s4333_s7 = inlined_call_operand.hbm [shape: f32[512,128], index: 7, kind: output, shape index: {}]  }
   0x1   :  { %4343 = sst [smem:[#allocation28_spill]] %s4326_s0 }
   0x2   :  { %4344 = sst [smem:[#allocation29_spill]] %s4327_s1 }
   0x3   :  { %4345 = sst [smem:[#allocation30_spill]] %s4328_s2 }
   0x4   :  { %4346 = sst [smem:[#allocation31_spill]] %s4329_s3 }
   0x5   :  { %4347 = sst [smem:[#allocation32_spill]] %s4330_s4 }
   0x6   :  { %4348 = sst [smem:[#allocation33_spill]] %s4331_s5 }
   0x7   :  { %4349 = sst [smem:[#allocation34_spill]] %s4332_s6 }
   0x8   :  { %4350 = sst [smem:[#allocation35_spill]] %s4333_s7 }
   0x9   :  { %12 = vsyncpa [#allocation4], 0 }
   0xa   :  { %14 = vsyncpa [#allocation4 + $0x1], 0 }
   0xb   :  { %15 = vsyncpa [#allocation7], 0 }
   0xc   :  { %16 = vsyncpa [#allocation12], 0 }
   0xd   :  { %17 = vsyncpa [#allocation5], 0 }
   0xe   :  { %19 = vsyncpa [#allocation5 + $0x1], 0  ;;  %s3621_s24 = smov 0   ;;  %s3623_s25 = smov 0  }
   0xf   :  { %s3625_s26 = smov 0   ;;  %s3627_s27 = smov 0  }
  0x10   :  { %s3629_s28 = smov 0   ;;  %s3631_s29 = smov 0  }
  0x11   :  { %s3633_s30 = smov 0   ;;  %s3635_s8 = smov 0  }
  0x12   :  { %s3637_s9 = smov 0   ;;  %s3639_s10 = smov 0  }
  0x13   :  { %s3641_s11 = smov 0   ;;  %s3643_s12 = smov 0  }
  0x14   :  { %s3645_s13 = smov 0   ;;  %s3647_s14 = smov 0  }
  0x15 LB: > { %4351 = sst [smem:[#allocation21_spill]] %s3515_s24  ;;  %s34_s15 = sadd.s32 1, %s3559_s12  ;;  %s3567_s14 = sphi %s3647_s14, %s25_s14   ;;  %s3563_s13 = sphi %s3645_s13, %s4401_s13   ;;  %s3559_s12 = sphi %s3643_s12, %s4390_s12   ;;  %s3555_s11 = sphi %s3641_s11, %s4400_s11   ;;  %s3551_s10 = sphi %s3639_s10, %s4389_s10   ;;  %s3547_s9 = sphi %s3637_s9, %s4399_s9   ;;  %s3543_s8 = sphi %s3635_s8, %s4398_s8   ;;  %s3539_s30 = sphi %s3633_s30, %s4397_s30   ;;  %s3535_s29 = sphi %s3631_s29, %s4396_s29   ;;  %s3531_s28 = sphi %s3629_s28, %s4395_s28   ;;  %s3527_s27 = sphi %s3627_s27, %s4394_s27   ;;  %s3523_s26 = sphi %s3625_s26, %s4393_s26   ;;  %s3519_s25 = sphi %s3623_s25, %s4392_s25   ;;  %s3515_s24 = sphi %s3621_s24, %s4388_s24  }
  0x16   : > { %4352 = sst [smem:[#allocation22_spill]] %s3519_s25  ;;  %s37_s16 = sadd.s32 1, %s3563_s13 }
  0x17   : > { %4353 = sst [smem:[#allocation23_spill]] %s3551_s10  ;;  %p35_p0 = scmp.ge.s32.totalorder %s34_s15, 3 }
  0x18   : > { %4354 = sst [smem:[#allocation24_spill]] %s3555_s11  ;;  %s46_s17 = sadd.s32 1, %s3547_s9 }
  0x19   : > { %4355 = sst [smem:[#allocation25_spill]] %s3559_s12  ;;  %p53_p1 = scmp.ne.s32.totalorder %s3547_s9, %s3543_s8 }
  0x1a   : > { %p54_p2 = scmp.eq.s32.totalorder %s3567_s14, 0  ;;  %s4403_s15 = smov (%p35_p0, %s34_s15), 0 }
  0x1b   : > { %4356 = sst [smem:[#allocation26_spill]] %s4403_s15  ;;  %s4405_s16 = smov (!%p35_p0, %s37_s16), %s3563_s13 }
  0x1c   : > { %s3702_s18 = ssub.s32 %s3559_s12, %s4403_s15  ;;  %p3706_p3 = por %p54_p2, %p53_p1 }
  0x1d   : > { %p39_p4 = scmp.ge.s32.totalorder %s4405_s16, 2  ;;  %p59_p5 = scmp.ne.s32.totalorder %s3543_s8, %s3539_s30 }
  0x1e   : > { %p119_p6 = scmp.eq.s32.totalorder %s3702_s18, 0  ;;  %p3088_p7 = scmp.lt.s32.totalorder %s3567_s14, 6 }
  0x1f   : > { %s4407_s16 = smov (%p39_p4, %s4405_s16), 0  ;;  %s292_s20 = sand.u32 1, %s3567_s14  }
  0x20   : > { %4358 = sst [smem:[#allocation27_spill]] %s4407_s16  ;;  %s3719_s21 = ssub.s32 %s3563_s13, %s4407_s16 }
  0x21   : > { %s43_s22 = sor.u32 %s3719_s21, %s3702_s18  ;;  %p145_p8 = scmp.eq.s32.totalorder %s3719_s21, 0 }
  0x22   : > { %p44_p9 = scmp.eq.s32.totalorder %s43_s22, 0  ;;  %s294_s23 = sand.u32 1, %s3547_s9  }
  0x23   : > { %s2456_s15 = sshll.u32 %s294_s23, 9  ;;  %s2869_s7 = sshll.u32 %s3563_s13, 7 }
  0x24   : > { %s3727_s2 = scalar_select %p44_p9, %s3547_s9, %s46_s17  }
  0x25   : > { %s2459_s10 = sshll.u32 %s3559_s12, 8  ;;  %s296_s4 = scalar_lea.vmem [#allocation3], %s2456_s15 }
  0x26   : > { %s302_s11 = sadd.s32 %s2869_s7, %s2459_s10  ;;  %s307_s6 = sshll.u32 %s296_s4, 4  ;;  %s308_s6 = int_to_ptr.vmem [resolvable:$true] %s307_s6 }
  0x27   : > { %s2460_s16 = sshll.u32 %s302_s11, 2  ;;  %s4359_s0 = sld [smem:[#allocation28_spill]] }
  0x28   : > { %p3072_p10 = pnand %p3088_p7, %p3706_p3  ;;  %s3737_s17 = scalar_lea.sflag [#allocation4], %s292_s20 }
  0x29   : > { %s3569_s7 = smov 256   ;;  %s3570_s10 = smov 16  }
  0x2a   : > { %s3741_s4 = sadd.s32 4294967295, %s3567_s14   ;;  %p2451_p13 = scmp.ge.s32.totalorder %s3567_s14, 1 }
  0x2b   : > { %p60_p11 = scmp.eq.s32.totalorder %s3741_s4, 0  ;;  %p226_p12 = scmp.eq.s32.totalorder %s3741_s4, 5 }
  0x2c   : > { %p239_p0 = scmp.lt.s32.totalorder %s3567_s14, 7  ;;  %s4362_s1 = sld [smem:[#allocation29_spill]] }
  0x2d   : > { %s304_s22 = scalar_lea.hbm %s4359_s0, %s2460_s16  ;;  %p3752_p1 = por %p60_p11, %p59_p5 }
  0x2e   : > { %s305_s23 = sshll.u32 %s304_s22, 4  ;;  %p3756_p3 = pnand %p2451_p13, %p239_p0  ;;  %s306_s23 = int_to_ptr.hbm [resolvable:$true] %s305_s23 }
  0x2f   : > { %3074 = dma.hbm_to_vmem [thread:$0]  (!%p3072_p10), %s306_s23, 8192, %s308_s6, %s3737_s17, %s3569_s7, %s3569_s7, %s3570_s10  }
  0x30   : > { %p3061_p4 = pneg %p3756_p3  ;;  %s3571_s30 = smov [#allocation6]  }
  0x31   : > { %s252_s16 = sshll.u32 %s3571_s30, 4  ;;  %s3572_s20 = smov 64   ;;  %s253_s16 = int_to_ptr.vmem [resolvable:$true] %s252_s16 }
  0x32   : > { %s250_s15 = sshll.u32 %s4362_s1, 4  ;;  %p3767_p5 = pnand %p3061_p4, %p60_p11  ;;  %s251_s15 = int_to_ptr.hbm [resolvable:$true] %s250_s15 }
  0x33   : > { %s3573_s22 = smov 4   ;;  %s121_s23 = sadd.s32 1, %s3535_s29 }
  0x34   : > { %3064 = dma.hbm_to_vmem [thread:$0]  (!%p3767_p5), %s251_s15, 4096, %s253_s16, [#allocation7], %s3572_s20, %s3572_s20, %s3573_s22  }
  0x35   : > { %s3777_s7 = scalar_select %p119_p6, %s3535_s29, %s121_s23  }
  0x36   : > { %p128_p9 = scmp.ne.s32.totalorder %s3535_s29, %s3531_s28  ;;  %p134_p10 = scmp.ne.s32.totalorder %s3531_s28, %s3527_s27 }
  0x37   : > { %s332_s25 = sand.u32 1, %s3535_s29   ;;  %s2870_s11 = sshll.u32 %s3559_s12, 7 }
  0x38   : > { %p130_p13 = por %p128_p9, %p54_p2  ;;  %p3787_p0 = por %p134_p10, %p60_p11 }
  0x39   : > { %s2461_s30 = sshll.u32 %s332_s25, 7  ;;  %s4365_s3 = sld [smem:[#allocation31_spill]] }
  0x3a   : > { %s334_s20 = scalar_lea.vmem [#allocation8], %s2461_s30  ;;  %p3075_p6 = pnand %p3088_p7, %p130_p13 }
  0x3b   : > { %s342_s27 = sshll.u32 %s334_s20, 4  ;;  %s4366_s5 = sld [smem:[#allocation33_spill]]  ;;  %s343_s27 = int_to_ptr.vmem [resolvable:$true] %s342_s27 }
  0x3c   : > { %s4367_s25 = sld [smem:[#allocation22_spill]]  ;;  %s4340_s0 = smov 128  }
  0x3d   : > { %s4368_s30 = sld [smem:[#allocation21_spill]]  ;;  %s3576_s15 = smov [#allocation10]  }
  0x3e   : > { %s4369_s23 = sld [smem:[#allocation34_spill]]  ;;  %s4376_s12 = smov 128  }
  0x3f   : > { %s339_s16 = scalar_lea.hbm %s4365_s3, %s2870_s11  ;;  %s4341_s11 = smov 8  }
  0x40   : > { %s340_s18 = sshll.u32 %s339_s16, 4  ;;  %s266_s16 = sshll.u32 %s3576_s15, 4  ;;  %s341_s18 = int_to_ptr.hbm [resolvable:$true] %s340_s18  ;;  %s267_s16 = int_to_ptr.vmem [resolvable:$true] %s266_s16 }
  0x41   : > { %s264_s1 = sshll.u32 %s4366_s5, 4  ;;  %s3577_s5 = smov [#allocation11]   ;;  %s265_s1 = int_to_ptr.hbm [resolvable:$true] %s264_s1 }
  0x42   : > { %3077 = dma.hbm_to_vmem [thread:$0]  (!%p3075_p6), %s341_s18, 2048, %s343_s27, %s3737_s17, %s4340_s0, %s4340_s0, %s4341_s11  }
  0x43   : > { %3067 = dma.hbm_to_vmem [thread:$0]  (!%p3767_p5), %s265_s1, 2048, %s267_s16, [#allocation7], %s4340_s0, %s4340_s0, %s4341_s11  }
  0x44   : > { %s279_s3 = sshll.u32 %s4369_s23, 4  ;;  %s281_s18 = sshll.u32 %s3577_s5, 4  ;;  %s280_s3 = int_to_ptr.hbm [resolvable:$true] %s279_s3  ;;  %s282_s18 = int_to_ptr.vmem [resolvable:$true] %s281_s18 }
  0x45   : > { %3070 = dma.hbm_to_vmem [thread:$0]  (!%p3767_p5), %s280_s3, 16, %s282_s18, [#allocation12]  }
  0x46   : > { %s2450_s27 = sadd.s32 4294967294, %s3567_s14   ;;  %s147_s15 = sadd.s32 1, %s3523_s26 }
  0x47   : > { %p154_p4 = scmp.ne.s32.totalorder %s3523_s26, %s4367_s25  ;;  %p160_p10 = scmp.ne.s32.totalorder %s4367_s25, %s4368_s30 }
  0x48   : > { %s3822_s20 = scalar_select %p145_p8, %s3523_s26, %s147_s15  }
  0x49   : > { %p3826_p9 = por %p154_p4, %p54_p2  ;;  %p3834_p13 = por %p226_p12, %p154_p4 }
  0x4a   : > { %p232_p5 = scmp.eq.s32.totalorder %s2450_s27, 5  ;;  %p3840_p6 = por %p160_p10, %p60_p11 }
  0x4b   : > { %s354_s5 = sand.u32 1, %s3523_s26   ;;  %s2871_s16 = sshll.u32 %s3563_s13, 8 }
  0x4c   : > { %p3845_p8 = por %p232_p5, %p160_p10  ;;  %s2464_s19 = sshll.u32 %s354_s5, 8 }
  0x4d   : > { %s4374_s30 = sld [smem:[#allocation32_spill]]  ;;  %s356_s15 = scalar_lea.vmem [#allocation9], %s2464_s19 }
  0x4e   : > { %s364_s0 = sshll.u32 %s356_s15, 4  ;;  %p3078_p2 = pnand %p3088_p7, %p3826_p9  ;;  %s365_s0 = int_to_ptr.vmem [resolvable:$true] %s364_s0 }
  0x4f   : > { %s4375_s27 = smov 8   ;;  %s378_s5 = sand.u32 (!%p3756_p3), 1, %s3741_s4  }
  0x50   : > { %s379_s23 = scalar_lea.sflag (!%p3756_p3), [#allocation4], %s378_s5 }
  0x51   : > { %376 = sbr.rel (%p3756_p3) target bundleno = 1016 (0x3f8), region = 48 }
  0x53   : > { %s361_s18 = scalar_lea.hbm %s4374_s30, %s2871_s16  ;;  %s380_s16 = sand.u32 (!%p3756_p3), 1, %s3543_s8  }
  0x54   : > { %s362_s11 = sshll.u32 %s361_s18, 4  ;;  %s2468_s19 = sshll.u32 (!%p3756_p3), %s380_s16, 9  ;;  %s363_s11 = int_to_ptr.hbm [resolvable:$true] %s362_s11 }
  0x55   : > { %3080 = dma.hbm_to_vmem [thread:$0]  (!%p3078_p2), %s363_s11, 4096, %s365_s0, %s3737_s17, %s4376_s12, %s4376_s12, %s4375_s27  }
  0x56   : > { %s3865_s25 = scalar_lea.vmem [#allocation3], %s2468_s19 }
  0x57   : > { %3486 = dma.done.wait (%p3752_p1), %s379_s23, 8192  }
  0x58   : > { %3488 = vsyncadd (%p3752_p1), %s379_s23, 4294959104 }
  0x59   : > { %3490 = dma.done.wait (%p60_p11), [#allocation7], 4096  }
  0x5a   : > { %3492 = vsyncadd (%p60_p11), [#allocation7], 4294963200  ;;  %s395_s12 = sand.u32 1, %s3531_s28  }
  0x5b   : > { %s2470_s17 = sshll.u32 %s395_s12, 7 }
  0x5c   : > { %s3876_s24 = scalar_lea.vmem [#allocation8], %s2470_s17 }
  0x5d   : > { %3494 = dma.done.wait (%p3787_p0), %s379_s23, 2048  }
  0x5e   : > { %3496 = vsyncadd (%p3787_p0), %s379_s23, 4294965248  ;;  %s4377_s0 = sld [smem:[#allocation22_spill]] }
  0x64   : > { %s405_s6 = sand.u32 1, %s4377_s0  }
  0x65   : > { %s2471_s11 = sshll.u32 %s405_s6, 8 }
  0x66   : > { %s3885_s22 = scalar_lea.vmem [#allocation9], %s2471_s11 }
  0x67   : > { %3498 = dma.done.wait (%p3840_p6), %s379_s23, 4096  }
  0x68   : > { %3500 = vsyncadd (%p3840_p6), %s379_s23, 4294963200 }
  0x69   : > { %3502 = dma.done.wait (%p60_p11), [#allocation7], 2048  }
  0x6a   : > { %3504 = vsyncadd (%p60_p11), [#allocation7], 4294965248 }
  0x6b   : > { %3506 = dma.done.wait (%p60_p11), [#allocation12], 16  }
  0x6c   : > { %3508 = vsyncadd (%p60_p11), [#allocation12], 4294967280  ;;  %s4378_s10 = sld [smem:[#allocation24_spill]]  ;;  %s3907_s17 = scalar_lea.vmem [#allocation13], %s2471_s11 }
  0x6d   : > { %s4379_s30 = sld [smem:[#allocation23_spill]] }
  0x6e   : > { %s4380_s23 = sld [smem:[#allocation30_spill]] }
  0x72   : > { %s2475_s18 = sshll.u32 %s4378_s10, 5 }
  0x73   : > { %p470_p7 = scmp.lt.s32.totalorder %s4379_s30, 2  ;;  %p472_p12 = scmp.lt.s32.totalorder %s2475_s18, 63 }
  0x74   : > { %p2478_p11 = scmp.ne.s32.totalorder %s4379_s30, 0 }
  0x75   : > { %s471_s3 = scalar_select %p470_p7, %s4379_s30, 2 }
  0x76   : > { %s4409_s18 = smov (!%p472_p12, %s2475_s18), 63  ;;  %484 = sbr.rel (%p2478_p11) target bundleno = 345 (0x159), region = 76 }
  0x77   : > { %s2476_s15 = sshll.u32 %s471_s3, 6 }
  0x78   : > { %s475_s27 = sadd.s32 %s2476_s15, %s4409_s18 }
  0x79   : > { %s2477_s5 = sshll.u32 %s475_s27, 3 }
  0x7a   : > { %s3905_s12 = scalar_lea.vmem %s4380_s23, %s2477_s5 }
  0x7b   : > { %v532_v0 = vld [vmem:[#allocation10 + $0x78] sm:$0xff]  ;;  %v531_v1 = vld [vmem:[#allocation10 + $0x70] sm:$0xff]  ;;  %v530_v2 = vld [vmem:[#allocation10 + $0x68] sm:$0xff] }
  0x7c   : > { %2970 = vmatpush.msra.mxu2 %v532_v0  ;;  %2971 = vmatpush.msra.mxu3 %v532_v0  ;;  %v529_v3 = vld [vmem:[#allocation10 + $0x60] sm:$0xff]  ;;  %v528_v4 = vld [vmem:[#allocation10 + $0x58] sm:$0xff]  ;;  %v527_v5 = vld [vmem:[#allocation10 + $0x50] sm:$0xff] }
  0x7d   : > { %533 = vmatpush.msra.mxu0 %v532_v0  ;;  %2969 = vmatpush.msra.mxu1 %v532_v0  ;;  %v526_v6 = vld [vmem:[#allocation10 + $0x48] sm:$0xff]  ;;  %v525_v7 = vld [vmem:[#allocation10 + $0x40] sm:$0xff]  ;;  %v524_v8 = vld [vmem:[#allocation10 + $0x38] sm:$0xff] }
  0x7e   : > { %2973 = vmatpush.msra.mxu2 %v531_v1  ;;  %2974 = vmatpush.msra.mxu3 %v531_v1  ;;  %v523_v9 = vld [vmem:[#allocation10 + $0x30] sm:$0xff]  ;;  %v522_v10 = vld [vmem:[#allocation10 + $0x28] sm:$0xff]  ;;  %v521_v11 = vld [vmem:[#allocation10 + $0x20] sm:$0xff] }
  0x7f   : > { %534 = vmatpush.msra.mxu0 %v531_v1  ;;  %2972 = vmatpush.msra.mxu1 %v531_v1  ;;  %v520_v12 = vld [vmem:[#allocation10 + $0x18] sm:$0xff]  ;;  %v519_v13 = vld [vmem:[#allocation10 + $0x10] sm:$0xff]  ;;  %v518_v14 = vld [vmem:[#allocation10 + $0x8] sm:$0xff] }
  0x80   : > { %2976 = vmatpush.msra.mxu2 %v530_v2  ;;  %2977 = vmatpush.msra.mxu3 %v530_v2  ;;  %v517_v15 = vld [vmem:[#allocation10] sm:$0xff]  ;;  %v502_v20 = vld [vmem:[%s3885_s22 + $0x88] sm:$0xff]  ;;  %v503_v24 = vld [vmem:[%s3885_s22 + $0x90] sm:$0xff] }
  0x81   : > { %535 = vmatpush.msra.mxu0 %v530_v2  ;;  %2975 = vmatpush.msra.mxu1 %v530_v2  ;;  %v501_v16 = vld [vmem:[%s3885_s22 + $0x80] sm:$0xff]  ;;  %v510_v21 = vld [vmem:[%s3885_s22 + $0xc8] sm:$0xff]  ;;  %v511_v25 = vld [vmem:[%s3885_s22 + $0xd0] sm:$0xff] }
  0x82   : > { %2979 = vmatpush.msra.mxu2 %v529_v3  ;;  %2980 = vmatpush.msra.mxu3 %v529_v3  ;;  %v509_v17 = vld [vmem:[%s3885_s22 + $0xc0] sm:$0xff]  ;;  %v486_v22 = vld [vmem:[%s3885_s22 + $0x8] sm:$0xff]  ;;  %v487_v26 = vld [vmem:[%s3885_s22 + $0x10] sm:$0xff] }
  0x83   : > { %536 = vmatpush.msra.mxu0 %v529_v3  ;;  %2978 = vmatpush.msra.mxu1 %v529_v3  ;;  %v485_v18 = vld [vmem:[%s3885_s22] sm:$0xff]  ;;  %v494_v23 = vld [vmem:[%s3885_s22 + $0x48] sm:$0xff]  ;;  %v495_v27 = vld [vmem:[%s3885_s22 + $0x50] sm:$0xff] }
  0x84   : > { %2982 = vmatpush.msra.mxu2 %v528_v4  ;;  %2983 = vmatpush.msra.mxu3 %v528_v4  ;;  %v493_v19 = vld [vmem:[%s3885_s22 + $0x40] sm:$0xff]  ;;  %v504_v28 = vld [vmem:[%s3885_s22 + $0x98] sm:$0xff]  ;;  %v506_v36 = vld [vmem:[%s3885_s22 + $0xa8] sm:$0xff] }
  0x85   : > { %537 = vmatpush.msra.mxu0 %v528_v4  ;;  %2981 = vmatpush.msra.mxu1 %v528_v4  ;;  %v512_v29 = vld [vmem:[%s3885_s22 + $0xd8] sm:$0xff]  ;;  %v505_v32 = vld [vmem:[%s3885_s22 + $0xa0] sm:$0xff]  ;;  %v514_v37 = vld [vmem:[%s3885_s22 + $0xe8] sm:$0xff] }
  0x86   : > { %2985 = vmatpush.msra.mxu2 %v527_v5  ;;  %2986 = vmatpush.msra.mxu3 %v527_v5  ;;  %v488_v30 = vld [vmem:[%s3885_s22 + $0x18] sm:$0xff]  ;;  %v513_v33 = vld [vmem:[%s3885_s22 + $0xe0] sm:$0xff]  ;;  %v490_v38 = vld [vmem:[%s3885_s22 + $0x28] sm:$0xff] }
  0x87   : > { %538 = vmatpush.msra.mxu0 %v527_v5  ;;  %2984 = vmatpush.msra.mxu1 %v527_v5  ;;  %v496_v31 = vld [vmem:[%s3885_s22 + $0x58] sm:$0xff]  ;;  %v489_v34 = vld [vmem:[%s3885_s22 + $0x20] sm:$0xff]  ;;  %v498_v39 = vld [vmem:[%s3885_s22 + $0x68] sm:$0xff] }
  0x88   : > { %2988 = vmatpush.msra.mxu2 %v526_v6  ;;  %2989 = vmatpush.msra.mxu3 %v526_v6  ;;  %v497_v35 = vld [vmem:[%s3885_s22 + $0x60] sm:$0xff]  ;;  %v507_v40 = vld [vmem:[%s3885_s22 + $0xb0] sm:$0xff]  ;;  %v508_v44 = vld [vmem:[%s3885_s22 + $0xb8] sm:$0xff] }
  0x89   : > { %539 = vmatpush.msra.mxu0 %v526_v6  ;;  %2987 = vmatpush.msra.mxu1 %v526_v6  ;;  %v515_v41 = vld [vmem:[%s3885_s22 + $0xf0] sm:$0xff]  ;;  %v516_v45 = vld [vmem:[%s3885_s22 + $0xf8] sm:$0xff] }
  0x8a   : > { %2991 = vmatpush.msra.mxu2 %v525_v7  ;;  %2992 = vmatpush.msra.mxu3 %v525_v7  ;;  %v491_v42 = vld [vmem:[%s3885_s22 + $0x30] sm:$0xff]  ;;  %v492_v46 = vld [vmem:[%s3885_s22 + $0x38] sm:$0xff] }
  0x8b   : > { %540 = vmatpush.msra.mxu0 %v525_v7  ;;  %2990 = vmatpush.msra.mxu1 %v525_v7  ;;  %v499_v43 = vld [vmem:[%s3885_s22 + $0x70] sm:$0xff]  ;;  %v500_v47 = vld [vmem:[%s3885_s22 + $0x78] sm:$0xff] }
  0x8c   : > { %2994 = vmatpush.msra.mxu2 %v524_v8  ;;  %2995 = vmatpush.msra.mxu3 %v524_v8 }
  0x8d   : > { %541 = vmatpush.msra.mxu0 %v524_v8  ;;  %2993 = vmatpush.msra.mxu1 %v524_v8 }
  0x8e   : > { %2997 = vmatpush.msra.mxu2 %v523_v9  ;;  %2998 = vmatpush.msra.mxu3 %v523_v9 }
  0x8f   : > { %542 = vmatpush.msra.mxu0 %v523_v9  ;;  %2996 = vmatpush.msra.mxu1 %v523_v9 }
  0x90   : > { %3000 = vmatpush.msra.mxu2 %v522_v10  ;;  %3001 = vmatpush.msra.mxu3 %v522_v10 }
  0x91   : > { %543 = vmatpush.msra.mxu0 %v522_v10  ;;  %2999 = vmatpush.msra.mxu1 %v522_v10 }
  0x92   : > { %3003 = vmatpush.msra.mxu2 %v521_v11  ;;  %3004 = vmatpush.msra.mxu3 %v521_v11 }
  0x93   : > { %544 = vmatpush.msra.mxu0 %v521_v11  ;;  %3002 = vmatpush.msra.mxu1 %v521_v11 }
  0x94   : > { %3006 = vmatpush.msra.mxu2 %v520_v12  ;;  %3007 = vmatpush.msra.mxu3 %v520_v12 }
  0x95   : > { %545 = vmatpush.msra.mxu0 %v520_v12  ;;  %3005 = vmatpush.msra.mxu1 %v520_v12 }
  0x96   : > { %3009 = vmatpush.msra.mxu2 %v519_v13  ;;  %3010 = vmatpush.msra.mxu3 %v519_v13 }
  0x97   : > { %546 = vmatpush.msra.mxu0 %v519_v13  ;;  %3008 = vmatpush.msra.mxu1 %v519_v13 }
  0x98   : > { %3012 = vmatpush.msra.mxu2 %v518_v14  ;;  %3013 = vmatpush.msra.mxu3 %v518_v14 }
  0x99   : > { %547 = vmatpush.msra.mxu0 %v518_v14  ;;  %3011 = vmatpush.msra.mxu1 %v518_v14 }
  0x9a   : > { %3015 = vmatpush.msra.mxu2 %v517_v15  ;;  %3016 = vmatpush.msra.mxu3 %v517_v15 }
  0x9b   : > { %597 = vmatmul.f32.vlgmr.msra.gmra.mxu2 %v501_v16  ;;  %621 = vmatmul.f32.vlgmr.msra.gmra.mxu3 %v509_v17 }
  0x9c   : > { %548 = vmatpush.msra.mxu0 %v517_v15  ;;  %3014 = vmatpush.msra.mxu1 %v517_v15 }
  0x9d   : > { %549 = vmatmul.f32.vlgmr.msra.gmra.mxu0 %v485_v18  ;;  %573 = vmatmul.f32.vlgmr.msra.gmra.mxu1 %v493_v19 }
  0xa3   : > { %600 = vmatmul.f32.gmra.mxu2 %v502_v20  ;;  %624 = vmatmul.f32.gmra.mxu3 %v510_v21 }
  0xa5   : > { %552 = vmatmul.f32.gmra.mxu0 %v486_v22  ;;  %576 = vmatmul.f32.gmra.mxu1 %v494_v23 }
  0xab   : > { %603 = vmatmul.f32.gmra.mxu2 %v503_v24  ;;  %627 = vmatmul.f32.gmra.mxu3 %v511_v25 }
  0xad   : > { %555 = vmatmul.f32.gmra.mxu0 %v487_v26  ;;  %579 = vmatmul.f32.gmra.mxu1 %v495_v27 }
  0xb3   : > { %606 = vmatmul.f32.gmra.mxu2 %v504_v28  ;;  %630 = vmatmul.f32.gmra.mxu3 %v512_v29 }
  0xb5   : > { %558 = vmatmul.f32.gmra.mxu0 %v488_v30  ;;  %582 = vmatmul.f32.gmra.mxu1 %v496_v31 }
  0xbb   : > { %609 = vmatmul.f32.gmra.mxu2 %v505_v32  ;;  %633 = vmatmul.f32.gmra.mxu3 %v513_v33 }
  0xbd   : > { %561 = vmatmul.f32.gmra.mxu0 %v489_v34  ;;  %585 = vmatmul.f32.gmra.mxu1 %v497_v35 }
  0xc3   : > { %612 = vmatmul.f32.gmra.mxu2 %v506_v36  ;;  %636 = vmatmul.f32.gmra.mxu3 %v514_v37 }
  0xc5   : > { %564 = vmatmul.f32.gmra.mxu0 %v490_v38  ;;  %588 = vmatmul.f32.gmra.mxu1 %v498_v39 }
  0xcb   : > { %615 = vmatmul.f32.gmra.mxu2 %v507_v40  ;;  %639 = vmatmul.f32.gmra.mxu3 %v515_v41 }
  0xcd   : > { %567 = vmatmul.f32.gmra.mxu0 %v491_v42  ;;  %591 = vmatmul.f32.gmra.mxu1 %v499_v43 }
  0xd3   : > { %618 = vmatmul.f32.gmra.mxu2 %v508_v44  ;;  %642 = vmatmul.f32.gmra.mxu3 %v516_v45 }
  0xd5   : > { %570 = vmatmul.f32.gmra.mxu0 %v492_v46  ;;  %594 = vmatmul.f32.gmra.mxu1 %v500_v47 }
 0x11a   : > { %v550_v48 = vpop.f32.mrf.mxu0  ;;  %v574_v49 = vpop.f32.mrf.mxu1 }
 0x11b   : > { %646 = vst [vmem:[#allocation2 + $0xb0] sm:$0xff] %v550_v48 }
 0x11c   : > { %654 = vst [vmem:[#allocation2 + $0x80] sm:$0xff] %v574_v49 }
 0x11e   : > { %v598_v50 = vpop.f32.mrf.mxu2  ;;  %v622_v51 = vpop.f32.mrf.mxu3 }
 0x11f   : > { %662 = vst [vmem:[#allocation2 + $0x38] sm:$0xff] %v598_v50 }
 0x120   : > { %670 = vst [vmem:[#allocation2 + $0xa8] sm:$0xff] %v622_v51 }
 0x122   : > { %v553_v52 = vpop.f32.mrf.mxu0  ;;  %v577_v53 = vpop.f32.mrf.mxu1 }
 0x123   : > { %647 = vst [vmem:[#allocation2] sm:$0xff] %v553_v52 }
 0x124   : > { %655 = vst [vmem:[#allocation2 + $0x88] sm:$0xff] %v577_v53 }
 0x126   : > { %v601_v54 = vpop.f32.mrf.mxu2  ;;  %v625_v55 = vpop.f32.mrf.mxu3 }
 0x127   : > { %663 = vst [vmem:[#allocation2 + $0x58] sm:$0xff] %v601_v54 }
 0x128   : > { %671 = vst [vmem:[#allocation2 + $0xd0] sm:$0xff] %v625_v55 }
 0x12a   : > { %v556_v56 = vpop.f32.mrf.mxu0  ;;  %v580_v57 = vpop.f32.mrf.mxu1 }
 0x12b   : > { %648 = vst [vmem:[#allocation2 + $0xd8] sm:$0xff] %v556_v56 }
 0x12c   : > { %656 = vst [vmem:[#allocation2 + $0xe8] sm:$0xff] %v580_v57 }
 0x12e   : > { %v604_v58 = vpop.f32.mrf.mxu2  ;;  %v628_v59 = vpop.f32.mrf.mxu3 }
 0x12f   : > { %664 = vst [vmem:[#allocation2 + $0x40] sm:$0xff] %v604_v58 }
 0x130   : > { %672 = vst [vmem:[#allocation2 + $0x10] sm:$0xff] %v628_v59 }
 0x132   : > { %v559_v60 = vpop.f32.mrf.mxu0  ;;  %v583_v61 = vpop.f32.mrf.mxu1 }
 0x133   : > { %649 = vst [vmem:[#allocation2 + $0x18] sm:$0xff] %v559_v60 }
 0x134   : > { %657 = vst [vmem:[#allocation2 + $0xb8] sm:$0xff] %v583_v61 }
 0x136   : > { %v607_v62 = vpop.f32.mrf.mxu2  ;;  %v631_v63 = vpop.f32.mrf.mxu3 }
 0x137   : > { %665 = vst [vmem:[#allocation2 + $0xc8] sm:$0xff] %v607_v62 }
 0x138   : > { %673 = vst [vmem:[#allocation2 + $0x28] sm:$0xff] %v631_v63 }
 0x13a   : > { %v562_v0 = vpop.f32.mrf.mxu0  ;;  %v586_v1 = vpop.f32.mrf.mxu1 }
 0x13b   : > { %650 = vst [vmem:[#allocation2 + $0x50] sm:$0xff] %v562_v0 }
 0x13c   : > { %658 = vst [vmem:[#allocation2 + $0x60] sm:$0xff] %v586_v1 }
 0x13e   : > { %v610_v2 = vpop.f32.mrf.mxu2  ;;  %v634_v3 = vpop.f32.mrf.mxu3 }
 0x13f   : > { %666 = vst [vmem:[#allocation2 + $0xe0] sm:$0xff] %v610_v2 }
 0x140   : > { %674 = vst [vmem:[#allocation2 + $0xa0] sm:$0xff] %v634_v3 }
 0x142   : > { %v565_v4 = vpop.f32.mrf.mxu0  ;;  %v589_v5 = vpop.f32.mrf.mxu1 }
 0x143   : > { %651 = vst [vmem:[#allocation2 + $0x68] sm:$0xff] %v565_v4 }
 0x144   : > { %659 = vst [vmem:[#allocation2 + $0xf0] sm:$0xff] %v589_v5 }
 0x146   : > { %v613_v6 = vpop.f32.mrf.mxu2  ;;  %v637_v7 = vpop.f32.mrf.mxu3 }
 0x147   : > { %667 = vst [vmem:[#allocation2 + $0x90] sm:$0xff] %v613_v6 }
 0x148   : > { %675 = vst [vmem:[#allocation2 + $0xf8] sm:$0xff] %v637_v7 }
 0x14a   : > { %v568_v8 = vpop.f32.mrf.mxu0  ;;  %v592_v9 = vpop.f32.mrf.mxu1 }
 0x14b   : > { %652 = vst [vmem:[#allocation2 + $0x30] sm:$0xff] %v568_v8 }
 0x14c   : > { %660 = vst [vmem:[#allocation2 + $0x8] sm:$0xff] %v592_v9 }
 0x14e   : > { %v616_v10 = vpop.f32.mrf.mxu2  ;;  %v640_v11 = vpop.f32.mrf.mxu3 }
 0x14f   : > { %668 = vst [vmem:[#allocation2 + $0x70] sm:$0xff] %v616_v10 }
 0x150   : > { %676 = vst [vmem:[#allocation2 + $0x20] sm:$0xff] %v640_v11 }
 0x152   : > { %v571_v12 = vpop.f32.mrf.mxu0  ;;  %v595_v13 = vpop.f32.mrf.mxu1 }
 0x153   : > { %653 = vst [vmem:[#allocation2 + $0x48] sm:$0xff] %v571_v12 }
 0x154   : > { %661 = vst [vmem:[#allocation2 + $0x78] sm:$0xff] %v595_v13 }
 0x156   : > { %v619_v14 = vpop.f32.mrf.mxu2  ;;  %v643_v15 = vpop.f32.mrf.mxu3 }
 0x157   : > { %669 = vst [vmem:[#allocation2 + $0xc0] sm:$0xff] %v619_v14 }
 0x158   : > { %677 = vst [vmem:[#allocation2 + $0x98] sm:$0xff] %v643_v15 }
 0x159 PF: > { %v2943_v16 = vld [vmem:[#allocation6 + $0x38] sm:$0xff]  ;;  %v2942_v17 = vld [vmem:[#allocation6 + $0x30] sm:$0xff]  ;;  %v3578_v18 = vmov 0   ;;  %v1674_v19 = vld [vmem:[%s3905_s12] sm:$0xff]  ;;  %s4381_s4 = sld [smem:[#allocation23_spill]] }
 0x15a   : > { %3017 = vmatpush.bf16.msra.mxu1 %v2943_v16  ;;  %3018 = vmatpush.bf16.msra.mxu2 %v2943_v16  ;;  %v2941_v20 = vld [vmem:[#allocation6 + $0x28] sm:$0xff]  ;;  %v2940_v21 = vld [vmem:[#allocation6 + $0x20] sm:$0xff]  ;;  %v2939_v23 = vld [vmem:[#allocation6 + $0x18] sm:$0xff] }
 0x15b   : > { %3019 = vmatpush.bf16.msra.mxu3 %v2943_v16  ;;  %3217 = vset.pattern.permute.xlu0 %v3578_v18  ;;  %v1675_v22 = vld [vmem:[%s3905_s12 + $0x8] sm:$0xff]  ;;  %v2938_v24 = vld [vmem:[#allocation6 + $0x10] sm:$0xff]  ;;  %v2936_v28 = vld [vmem:[#allocation6] sm:$0xff] }
 0x15c   : > { %3218 = vset.pattern.permute.xlu1 %v3578_v18  ;;  %1318 = vmatpush.bf16.msra.mxu0 %v2943_v16  ;;  %v1676_v25 = vld [vmem:[%s3905_s12 + $0x10] sm:$0xff]  ;;  %v2937_v27 = vld [vmem:[#allocation6 + $0x8] sm:$0xff]  ;;  %v2545_v29 = vld [vmem:[%s3865_s25 + $0x80] sm:$0xf] }
 0x15d   : > { %3219 = vset.pattern.permute.xlu2 %v3578_v18  ;;  %1708 = vperm.xlu0 %3217, %v1674_v19   ;;  %v1680_v26 = vld [vmem:[%s3905_s12 + $0x30] sm:$0xff]  ;;  %v1677_v30 = vld [vmem:[%s3905_s12 + $0x18] sm:$0xff]  ;;  %v2609_v32 = vld [vmem:[%s3865_s25 + $0x100] sm:$0xf] }
 0x15e   : > { %3020 = vmatpush.bf16.msra.mxu1 %v2942_v17  ;;  %3021 = vmatpush.bf16.msra.mxu2 %v2942_v17  ;;  %v2890_v31 = vld [vmem:[%s3865_s25 + $0x8c] sm:$0xf0]  ;;  %v2673_v34 = vld [vmem:[%s3865_s25 + $0x180] sm:$0xf]  ;;  %v2959_v36 = vld [vmem:[#allocation6 + $0xb8] sm:$0xff] }
 0x15f   : > { %3022 = vmatpush.bf16.msra.mxu3 %v2942_v17  ;;  %1718 = vperm.xlu1 %3218, %v1676_v25   ;;  %v2906_v33 = vld [vmem:[%s3865_s25 + $0x10c] sm:$0xf0]  ;;  %v2967_v37 = vld [vmem:[#allocation6 + $0xf8] sm:$0xff]  ;;  %v2546_v39 = vor.u32 %v2890_v31, %v2545_v29  ;;  %v1683_v43 = vld [vmem:[%s3905_s12 + $0x48] sm:$0xff]  ;;  %p2863_p1 = scmp.ne.s32.totalorder %s4381_s4, 2 }
 0x160   : > { %1319 = vmatpush.bf16.msra.mxu0 %v2942_v17  ;;  %v2922_v35 = vld [vmem:[%s3865_s25 + $0x18c] sm:$0xf0]  ;;  %v2951_v38 = vld [vmem:[#allocation6 + $0x78] sm:$0xff]  ;;  %v2610_v40 = vor.u32 %v2906_v33, %v2609_v32  ;;  %v2957_v46 = vld [vmem:[#allocation6 + $0xa8] sm:$0xff] }
 0x161   : > { %v2674_v41 = vor.u32 %v2922_v35, %v2673_v34  ;;  %v2958_v42 = vld [vmem:[#allocation6 + $0xb0] sm:$0xff]  ;;  %v1681_v47 = vld [vmem:[%s3905_s12 + $0x38] sm:$0xff]  ;;  %v2965_v48 = vld [vmem:[#allocation6 + $0xe8] sm:$0xff] }
 0x162   : > { %3023 = vmatpush.bf16.msra.mxu1 %v2941_v20  ;;  %3024 = vmatpush.bf16.msra.mxu2 %v2941_v20  ;;  %v2966_v44 = vld [vmem:[#allocation6 + $0xf0] sm:$0xff]  ;;  %v2949_v49 = vld [vmem:[#allocation6 + $0x68] sm:$0xff]  ;;  %v2956_v50 = vld [vmem:[#allocation6 + $0xa0] sm:$0xff] }
 0x163   : > { %3025 = vmatpush.bf16.msra.mxu3 %v2941_v20  ;;  %v2950_v45 = vld [vmem:[#allocation6 + $0x70] sm:$0xff]  ;;  %v1686_v51 = vld [vmem:[%s3905_s12 + $0x60] sm:$0xff]  ;;  %v2955_v61 = vld [vmem:[#allocation6 + $0x98] sm:$0xff] }
 0x164   : > { %1320 = vmatpush.bf16.msra.mxu0 %v2941_v20  ;;  %v2964_v52 = vld [vmem:[#allocation6 + $0xe0] sm:$0xff]  ;;  %v2894_v55 = vld [vmem:[%s3865_s25 + $0xac] sm:$0xf0]  ;;  %v2963_v62 = vld [vmem:[#allocation6 + $0xd8] sm:$0xff] }
 0x165   : > { %1713 = vperm.xlu0 %3217, %v1675_v22   ;;  %v2948_v53 = vld [vmem:[#allocation6 + $0x60] sm:$0xff]  ;;  %v2910_v57 = vld [vmem:[%s3865_s25 + $0x12c] sm:$0xf0]  ;;  %v2947_v63 = vld [vmem:[#allocation6 + $0x58] sm:$0xff] }
 0x166   : > { %3026 = vmatpush.bf16.msra.mxu1 %v2940_v21  ;;  %3027 = vmatpush.bf16.msra.mxu2 %v2940_v21  ;;  %v2561_v54 = vld [vmem:[%s3865_s25 + $0xa0] sm:$0xf]  ;;  %v1684_v58 = vld [vmem:[%s3905_s12 + $0x50] sm:$0xff]  ;;  %v1689_v4 = vld [vmem:[%s3905_s12 + $0x78] sm:$0xff] }
 0x167   : > { %3028 = vmatpush.bf16.msra.mxu3 %v2940_v21  ;;  %1723 = vperm.xlu1 %3218, %v1677_v30   ;;  %v2625_v56 = vld [vmem:[%s3865_s25 + $0x120] sm:$0xf]  ;;  %v2926_v60 = vld [vmem:[%s3865_s25 + $0x1ac] sm:$0xf0]  ;;  %v2562_v0 = vor.u32 %v2894_v55, %v2561_v54  ;;  %v2953_v7 = vld [vmem:[#allocation6 + $0x88] sm:$0xff] }
 0x168   : > { %1321 = vmatpush.bf16.msra.mxu0 %v2940_v21  ;;  %v2689_v59 = vld [vmem:[%s3865_s25 + $0x1a0] sm:$0xf]  ;;  %v2626_v1 = vor.u32 %v2910_v57, %v2625_v56  ;;  %v2954_v3 = vld [vmem:[#allocation6 + $0x90] sm:$0xff]  ;;  %v2961_v8 = vld [vmem:[#allocation6 + $0xc8] sm:$0xff] }
 0x169   : > { %v2690_v2 = vor.u32 %v2926_v60, %v2689_v59  ;;  %v2962_v5 = vld [vmem:[#allocation6 + $0xd0] sm:$0xff]  ;;  %v1687_v9 = vld [vmem:[%s3905_s12 + $0x68] sm:$0xff]  ;;  %v2481_v11 = vld [vmem:[%s3865_s25] sm:$0xf] }
 0x16a   : > { %3029 = vmatpush.bf16.msra.mxu1 %v2939_v23  ;;  %3030 = vmatpush.bf16.msra.mxu2 %v2939_v23  ;;  %v2946_v6 = vld [vmem:[#allocation6 + $0x50] sm:$0xff]  ;;  %v2945_v10 = vld [vmem:[#allocation6 + $0x48] sm:$0xff]  ;;  %v2952_v15 = vld [vmem:[#allocation6 + $0x80] sm:$0xff] }
 0x16b   : > { %3031 = vmatpush.bf16.msra.mxu3 %v2939_v23  ;;  %v2874_v12 = vld [vmem:[%s3865_s25 + $0xc] sm:$0xf0]  ;;  %v2960_v16 = vld [vmem:[#allocation6 + $0xc0] sm:$0xff]  ;;  %v1693_v30 = vld [vmem:[%s3905_s12 + $0x98] sm:$0xff] }
 0x16c   : > { %1322 = vmatpush.bf16.msra.mxu0 %v2939_v23  ;;  %v2482_v13 = vor.u32 %v2874_v12, %v2481_v11  ;;  %v1692_v14 = vld [vmem:[%s3905_s12 + $0x90] sm:$0xff]  ;;  %v2944_v17 = vld [vmem:[#allocation6 + $0x40] sm:$0xff]  ;;  %v1679_v35 = vld [vmem:[%s3905_s12 + $0x28] sm:$0xff] }
 0x16d   : > { %1738 = vperm.xlu0 %3217, %v1680_v26   ;;  %v2577_v18 = vld [vmem:[%s3865_s25 + $0xc0] sm:$0xf]  ;;  %v2898_v19 = vld [vmem:[%s3865_s25 + $0xcc] sm:$0xf0]  ;;  %v2872_v54 = vld [vmem:[%s3865_s25 + $0x4] sm:$0xf] }
 0x16e   : > { %3032 = vmatpush.bf16.msra.mxu1 %v2938_v24  ;;  %3033 = vmatpush.bf16.msra.mxu2 %v2938_v24  ;;  %v2641_v20 = vld [vmem:[%s3865_s25 + $0x140] sm:$0xf]  ;;  %v2914_v21 = vld [vmem:[%s3865_s25 + $0x14c] sm:$0xf0]  ;;  %v2578_v25 = vor.u32 %v2898_v19, %v2577_v18  ;;  %v2483_v55 = vld [vmem:[%s3865_s25 + $0x10] sm:$0xf0] }
 0x16f   : > { %3034 = vmatpush.bf16.msra.mxu3 %v2938_v24  ;;  %1743 = vperm.xlu1 %3218, %v1681_v47   ;;  %v1690_v22 = vld [vmem:[%s3905_s12 + $0x80] sm:$0xff]  ;;  %v2642_v26 = vor.u32 %v2914_v21, %v2641_v20  ;;  %v2878_v32 = vld [vmem:[%s3865_s25 + $0x2c] sm:$0xf0]  ;;  %v2489_v56 = vld [vmem:[%s3865_s25 + $0x8] sm:$0xf] }
 0x170   : > { %1323 = vmatpush.bf16.msra.mxu0 %v2938_v24  ;;  %v2705_v23 = vld [vmem:[%s3865_s25 + $0x1c0] sm:$0xf]  ;;  %v2930_v24 = vld [vmem:[%s3865_s25 + $0x1cc] sm:$0xf0]  ;;  %v2875_v57 = vld [vmem:[%s3865_s25 + $0x14] sm:$0xf0] }
 0x171   : > { %v1678_v29 = vld [vmem:[%s3905_s12 + $0x20] sm:$0xff]  ;;  %v2873_v59 = vld [vmem:[%s3865_s25 + $0xc] sm:$0xf]  ;;  %v2491_v60 = vld [vmem:[%s3865_s25 + $0x18] sm:$0xf0] }
 0x172   : > { %3035 = vmatpush.bf16.msra.mxu1 %v2937_v27  ;;  %3036 = vmatpush.bf16.msra.mxu2 %v2937_v27  ;;  %v2497_v31 = vld [vmem:[%s3865_s25 + $0x20] sm:$0xf]  ;;  %v2507_v11 = vld [vmem:[%s3865_s25 + $0x38] sm:$0xf0]  ;;  %v2515_v18 = vld [vmem:[%s3865_s25 + $0x50] sm:$0xf0] }
 0x173   : > { %3037 = vmatpush.bf16.msra.mxu3 %v2937_v27  ;;  %1728 = vperm.xlu2 %3219, %v1678_v29   ;;  %v2498_v33 = vor.u32 %v2878_v32, %v2497_v31  ;;  %v1698_v34 = vld [vmem:[%s3905_s12 + $0xc0] sm:$0xff]  ;;  %v2521_v19 = vld [vmem:[%s3865_s25 + $0x48] sm:$0xf]  ;;  %v2883_v20 = vld [vmem:[%s3865_s25 + $0x54] sm:$0xf0] }
 0x174   : > { %1324 = vmatpush.bf16.msra.mxu0 %v2937_v27  ;;  %v2706_v27 = vor.u32 %v2930_v24, %v2705_v23  ;;  %v1682_v47 = vld [vmem:[%s3905_s12 + $0x40] sm:$0xff]  ;;  %v2881_v21 = vld [vmem:[%s3865_s25 + $0x4c] sm:$0xf]  ;;  %v2522_v24 = vor.u32 %v2883_v20, %v2521_v19  ;;  %v2531_v29 = vld [vmem:[%s3865_s25 + $0x70] sm:$0xf0] }
 0x175   : > { %1753 = vperm.xlu0 %3217, %v1683_v43   ;;  %v2887_v31 = vld [vmem:[%s3865_s25 + $0x74] sm:$0xf0]  ;;  %v2885_v32 = vld [vmem:[%s3865_s25 + $0x6c] sm:$0xf]  ;;  %v2587_v19 = vld [vmem:[%s3865_s25 + $0xd8] sm:$0xf0] }
 0x176   : > { %3038 = vmatpush.bf16.msra.mxu1 %v2936_v28  ;;  %3039 = vmatpush.bf16.msra.mxu2 %v2936_v28 }
 0x177   : > { %3040 = vmatpush.bf16.msra.mxu3 %v2936_v28  ;;  %1758 = vperm.xlu1 %3218, %v1684_v58   ;;  %v1702_v58 = vld [vmem:[%s3905_s12 + $0xe0] sm:$0xff] }
 0x178   : > { %1325 = vmatpush.bf16.msra.mxu0 %v2936_v28  ;;  %v1695_v28 = vld [vmem:[%s3905_s12 + $0xa8] sm:$0xff] }
 0x179   : > { %1346 = vmatmul.bf16.vlgmr.msra.gmra.mxu1 %v2546_v39  ;;  %1366 = vmatmul.bf16.vlgmr.msra.gmra.mxu2 %v2610_v40  ;;  %v2918_v39 = vld [vmem:[%s3865_s25 + $0x16c] sm:$0xf0] }
 0x17a   : > { %1496 = vmatpush.bf16.msrb.mxu2 %v2959_v36  ;;  %1407 = vmatpush.bf16.msrb.mxu1 %v2951_v38  ;;  %v2593_v36 = vld [vmem:[%s3865_s25 + $0xe0] sm:$0xf]  ;;  %v1696_v40 = vld [vmem:[%s3905_s12 + $0xb0] sm:$0xff] }
 0x17b   : > { %1585 = vmatpush.bf16.msrb.mxu3 %v2967_v37  ;;  %1326 = vmatmul.bf16.vlgmr.msra.gmra.mxu0 %v2482_v13  ;;  %v2902_v37 = vld [vmem:[%s3865_s25 + $0xec] sm:$0xf0]  ;;  %v2657_v38 = vld [vmem:[%s3865_s25 + $0x160] sm:$0xf] }
 0x17c   : > { %1386 = vmatmul.bf16.vlgmr.msra.gmra.mxu3 %v2674_v41  ;;  %v2721_v41 = vld [vmem:[%s3865_s25 + $0x1e0] sm:$0xf]  ;;  %1733 = vperm.xlu2 %3219, %v1679_v35   ;;  %v2594_v43 = vor.u32 %v2902_v37, %v2593_v36  ;;  %v1703_v36 = vld [vmem:[%s3905_s12 + $0xe8] sm:$0xff] }
 0x17d   : > { %1768 = vperm.xlu0 %3217, %v1686_v51  }
 0x17e   : > { %1497 = vmatpush.bf16.msrb.mxu2 %v2958_v42  ;;  %1408 = vmatpush.bf16.msrb.mxu1 %v2950_v45  ;;  %v2934_v42 = vld [vmem:[%s3865_s25 + $0x1ec] sm:$0xf0] }
 0x17f   : > { %1586 = vmatpush.bf16.msrb.mxu3 %v2966_v44  ;;  %1773 = vperm.xlu1 %3218, %v1687_v9   ;;  %v2658_v44 = vor.u32 %v2918_v39, %v2657_v38  ;;  %v2722_v45 = vor.u32 %v2934_v42, %v2721_v41  ;;  %v2879_v9 = vld [vmem:[%s3865_s25 + $0x34] sm:$0xf0]  ;;  %v1944_v38 = vld [vmem:[%s3876_s24 + $0x70] sm:$0xff]  ;;  %v1943_v39 = vld [vmem:[%s3876_s24 + $0x68] sm:$0xff] }
 0x180   : > { %v1941_v41 = vld [vmem:[%s3876_s24 + $0x58] sm:$0xff]  ;;  %v2888_v42 = vld [vmem:[%s3865_s25 + $0x84] sm:$0xf] }
 0x182   : > { %1498 = vmatpush.bf16.msrb.mxu2 %v2957_v46  ;;  %1409 = vmatpush.bf16.msrb.mxu1 %v2949_v49  ;;  %v1701_v46 = vld [vmem:[%s3905_s12 + $0xd8] sm:$0xff]  ;;  %v2513_v49 = vld [vmem:[%s3865_s25 + $0x40] sm:$0xf] }
 0x183   : > { %1587 = vmatpush.bf16.msrb.mxu3 %v2965_v48  ;;  %v1699_v48 = vld [vmem:[%s3905_s12 + $0xc8] sm:$0xff] }
 0x184   : > { %1748 = vperm.xlu2 %3219, %v1682_v47   ;;  %v2555_v47 = vld [vmem:[%s3865_s25 + $0x98] sm:$0xf0] }
 0x185   : > { %1783 = vperm.xlu0 %3217, %v1689_v4  }
 0x186   : > { %1499 = vmatpush.bf16.msrb.mxu2 %v2956_v50  ;;  %1410 = vmatpush.bf16.msrb.mxu1 %v2948_v53  ;;  %v2882_v50 = vld [vmem:[%s3865_s25 + $0x4c] sm:$0xf0]  ;;  %v1685_v53 = vld [vmem:[%s3905_s12 + $0x58] sm:$0xff] }
 0x187   : > { %1588 = vmatpush.bf16.msrb.mxu3 %v2964_v52  ;;  %1788 = vperm.xlu1 %3218, %v1690_v22   ;;  %v2514_v51 = vor.u32 %v2882_v50, %v2513_v49  ;;  %v1704_v52 = vld [vmem:[%s3905_s12 + $0xf0] sm:$0xff]  ;;  %v2523_v22 = vld [vmem:[%s3865_s25 + $0x58] sm:$0xf0] }
 0x189   : > { %1351 = vmatmul.bf16.gmra.mxu1 %v2562_v0  ;;  %1371 = vmatmul.bf16.gmra.mxu2 %v2626_v1  ;;  %v1688_v0 = vld [vmem:[%s3905_s12 + $0x70] sm:$0xff]  ;;  %v1705_v1 = vld [vmem:[%s3905_s12 + $0xf8] sm:$0xff] }
 0x18a   : > { %1500 = vmatpush.bf16.msrb.mxu2 %v2955_v61  ;;  %1411 = vmatpush.bf16.msrb.mxu1 %v2947_v63  ;;  %v2486_v61 = vor.u32 %v2872_v54, %v2483_v55  ;;  %v2494_v63 = vor.u32 %v2873_v59, %v2491_v60  ;;  %v2892_v59 = vld [vmem:[%s3865_s25 + $0xa4] sm:$0xf]  ;;  %v2563_v60 = vld [vmem:[%s3865_s25 + $0xb0] sm:$0xf0] }
 0x18b   : > { %1589 = vmatpush.bf16.msrb.mxu3 %v2963_v62  ;;  %1331 = vmatmul.bf16.gmra.mxu0 %v2498_v33  ;;  %v2490_v62 = vor.u32 %v2875_v57, %v2489_v56  ;;  %v2539_v33 = vld [vmem:[%s3865_s25 + $0x78] sm:$0xf0]  ;;  %v1938_v57 = vld [vmem:[%s3876_s24 + $0x40] sm:$0xff] }
 0x18c   : > { %1391 = vmatmul.bf16.gmra.mxu3 %v2690_v2  ;;  %1763 = vperm.xlu2 %3219, %v1685_v53   ;;  %v2529_v2 = vld [vmem:[%s3865_s25 + $0x60] sm:$0xf]  ;;  %v2542_v37 = vor.u32 %v2885_v32, %v2539_v33  ;;  %v1939_v53 = vld [vmem:[%s3876_s24 + $0x48] sm:$0xff]  ;;  %v2595_v33 = vld [vmem:[%s3865_s25 + $0xf0] sm:$0xf0] }
 0x18d   : > { %1798 = vperm.xlu0 %3217, %v1692_v14   ;;  %v1930_v32 = vld [vmem:[%s3876_s24] sm:$0xff] }
 0x18e   : > { %1501 = vmatpush.bf16.msrb.mxu2 %v2954_v3  ;;  %1412 = vmatpush.bf16.msrb.mxu1 %v2946_v6  ;;  %v2886_v3 = vld [vmem:[%s3865_s25 + $0x6c] sm:$0xf0]  ;;  %v2876_v6 = vld [vmem:[%s3865_s25 + $0x24] sm:$0xf] }
 0x18f   : > { %1590 = vmatpush.bf16.msrb.mxu3 %v2962_v5  ;;  %1803 = vperm.xlu1 %3218, %v1693_v30   ;;  %v2530_v4 = vor.u32 %v2886_v3, %v2529_v2  ;;  %v1691_v5 = vld [vmem:[%s3905_s12 + $0x88] sm:$0xff]  ;;  %v2566_v3 = vor.u32 %v2892_v59, %v2563_v60 }
 0x190   : > { %v2537_v30 = vld [vmem:[%s3865_s25 + $0x68] sm:$0xf] }
 0x191   : > { %v2538_v35 = vor.u32 %v2887_v31, %v2537_v30  ;;  %v2900_v31 = vld [vmem:[%s3865_s25 + $0xe4] sm:$0xf] }
 0x192   : > { %1502 = vmatpush.bf16.msrb.mxu2 %v2953_v7  ;;  %1413 = vmatpush.bf16.msrb.mxu1 %v2945_v10  ;;  %v2499_v7 = vld [vmem:[%s3865_s25 + $0x30] sm:$0xf0]  ;;  %v2877_v10 = vld [vmem:[%s3865_s25 + $0x2c] sm:$0xf] }
 0x193   : > { %1591 = vmatpush.bf16.msrb.mxu3 %v2961_v8  ;;  %v2505_v8 = vld [vmem:[%s3865_s25 + $0x28] sm:$0xf]  ;;  %v2502_v12 = vor.u32 %v2876_v6, %v2499_v7  ;;  %v2510_v14 = vor.u32 %v2877_v10, %v2507_v11  ;;  %v1936_v7 = vld [vmem:[%s3876_s24 + $0x30] sm:$0xff] }
 0x194   : > { %1778 = vperm.xlu2 %3219, %v1688_v0   ;;  %v2506_v13 = vor.u32 %v2879_v9, %v2505_v8  ;;  %v2571_v0 = vld [vmem:[%s3865_s25 + $0xb8] sm:$0xf0]  ;;  %v1935_v8 = vld [vmem:[%s3876_s24 + $0x28] sm:$0xff] }
 0x195   : > { %1813 = vperm.xlu0 %3217, %v1695_v28   ;;  %v2884_v28 = vld [vmem:[%s3865_s25 + $0x64] sm:$0xf] }
 0x196   : > { %1503 = vmatpush.bf16.msrb.mxu2 %v2952_v15  ;;  %1414 = vmatpush.bf16.msrb.mxu1 %v2944_v17  ;;  %v1694_v15 = vld [vmem:[%s3905_s12 + $0xa0] sm:$0xff] }
 0x197   : > { %1592 = vmatpush.bf16.msrb.mxu3 %v2960_v16  ;;  %1818 = vperm.xlu1 %3218, %v1696_v40   ;;  %v1697_v16 = vld [vmem:[%s3905_s12 + $0xb8] sm:$0xff]  ;;  %v2880_v17 = vld [vmem:[%s3865_s25 + $0x44] sm:$0xf] }
 0x198   : > { %v2518_v23 = vor.u32 %v2880_v17, %v2515_v18  ;;  %v1942_v40 = vld [vmem:[%s3876_s24 + $0x60] sm:$0xff]  ;;  %v2899_v17 = vld [vmem:[%s3865_s25 + $0xd4] sm:$0xf0]  ;;  %v2897_v18 = vld [vmem:[%s3865_s25 + $0xcc] sm:$0xf] }
 0x199   : > { %1356 = vmatmul.bf16.gmra.mxu1 %v2578_v25  ;;  %1376 = vmatmul.bf16.gmra.mxu2 %v2642_v26  ;;  %v2526_v25 = vor.u32 %v2881_v21, %v2523_v22  ;;  %v1700_v26 = vld [vmem:[%s3905_s12 + $0xd0] sm:$0xff] }
 0x19b   : > { %1336 = vmatmul.bf16.gmra.mxu0 %v2514_v51 }
 0x19c   : > { %1396 = vmatmul.bf16.gmra.mxu3 %v2706_v27  ;;  %1793 = vperm.xlu2 %3219, %v1691_v5   ;;  %v1945_v27 = vld [vmem:[%s3876_s24 + $0x78] sm:$0xff] }
 0x19d   : > { %1828 = vperm.xlu0 %3217, %v1698_v34   ;;  %1946 = vmatpush.msrb.mxu0 %v1945_v27  ;;  %v2534_v34 = vor.u32 %v2884_v28, %v2531_v29  ;;  %v1931_v27 = vld [vmem:[%s3876_s24 + $0x8] sm:$0xff] }
 0x19f   : > { %1833 = vperm.xlu1 %3218, %v1699_v48   ;;  %1947 = vmatpush.msrb.mxu0 %v1944_v38 }
 0x1a1   : > { %1948 = vmatpush.msrb.mxu0 %v1943_v39 }
 0x1a3   : > { %1949 = vmatpush.msrb.mxu0 %v1942_v40  ;;  %v2598_v40 = vor.u32 %v2900_v31, %v2595_v33 }
 0x1a4   : > { %1808 = vperm.xlu2 %3219, %v1694_v15   ;;  %v2579_v15 = vld [vmem:[%s3865_s25 + $0xd0] sm:$0xf0] }
 0x1a5   : > { %1843 = vperm.xlu0 %3217, %v1701_v46   ;;  %1950 = vmatpush.msrb.mxu0 %v1941_v41  ;;  %v2889_v46 = vld [vmem:[%s3865_s25 + $0x8c] sm:$0xf] }
 0x1a6   : > { %v2558_v51 = vor.u32 %v2889_v46, %v2555_v47 }
 0x1a7   : > { %1848 = vperm.xlu1 %3218, %v1702_v58   ;;  %v1937_v58 = vld [vmem:[%s3876_s24 + $0x38] sm:$0xff] }
 0x1a9   : > { %1361 = vmatmul.bf16.gmra.mxu1 %v2594_v43  ;;  %1381 = vmatmul.bf16.gmra.mxu2 %v2658_v44  ;;  %v2547_v43 = vld [vmem:[%s3865_s25 + $0x90] sm:$0xf0]  ;;  %v2553_v44 = vld [vmem:[%s3865_s25 + $0x88] sm:$0xf] }
 0x1aa   : > { %v2550_v48 = vor.u32 %v2888_v42, %v2547_v43 }
 0x1ab   : > { %1341 = vmatmul.bf16.gmra.mxu0 %v2530_v4 }
 0x1ac   : > { %1401 = vmatmul.bf16.gmra.mxu3 %v2722_v45  ;;  %1823 = vperm.xlu2 %3219, %v1697_v16   ;;  %v2891_v45 = vld [vmem:[%s3865_s25 + $0x94] sm:$0xf0]  ;;  %v2585_v16 = vld [vmem:[%s3865_s25 + $0xc8] sm:$0xf] }
 0x1ad   : > { %1858 = vperm.xlu0 %3217, %v1704_v52   ;;  %v2554_v49 = vor.u32 %v2891_v45, %v2553_v44  ;;  %v1940_v52 = vld [vmem:[%s3876_s24 + $0x50] sm:$0xff] }
 0x1ae   : > { %1951 = vmatpush.msrb.mxu0 %v1940_v52  ;;  %v2907_v52 = vld [vmem:[%s3865_s25 + $0x114] sm:$0xf0] }
 0x1af   : > { %1863 = vperm.xlu1 %3218, %v1705_v1  }
 0x1b0   : > { %1952 = vmatpush.msrb.mxu0 %v1939_v53  ;;  %v2905_v53 = vld [vmem:[%s3865_s25 + $0x10c] sm:$0xf] }
 0x1b2   : > { %1953 = vmatpush.msrb.mxu0 %v1938_v57  ;;  %v2619_v57 = vld [vmem:[%s3865_s25 + $0x118] sm:$0xf0] }
 0x1b4   : > { %1838 = vperm.xlu2 %3219, %v1700_v26   ;;  %1954 = vmatpush.msrb.mxu0 %v1937_v58  ;;  %v1932_v26 = vld [vmem:[%s3876_s24 + $0x10] sm:$0xff] }
 0x1b6   : > { %1955 = vmatpush.msrb.mxu0 %v1936_v7 }
 0x1b8   : > { %1956 = vmatpush.msrb.mxu0 %v1935_v8 }
 0x1b9   : > { %1415 = vmatmul.bf16.vlgmr.msrb.gmra.mxu1 %v2486_v61  ;;  %1504 = vmatmul.bf16.vlgmr.msrb.gmra.mxu2 %v2490_v62  ;;  %v2569_v61 = vld [vmem:[%s3865_s25 + $0xa8] sm:$0xf]  ;;  %v2895_v62 = vld [vmem:[%s3865_s25 + $0xb4] sm:$0xf0] }
 0x1ba   : > { %v2570_v4 = vor.u32 %v2895_v62, %v2569_v61 }
 0x1bc   : > { %1593 = vmatmul.bf16.vlgmr.msrb.gmra.mxu3 %v2494_v63  ;;  %1853 = vperm.xlu2 %3219, %v1703_v36   ;;  %v2893_v63 = vld [vmem:[%s3865_s25 + $0xac] sm:$0xf] }
 0x1bd   : > { %v2574_v6 = vor.u32 %v2893_v63, %v2571_v0  ;;  %v2901_v36 = vld [vmem:[%s3865_s25 + $0xec] sm:$0xf]  ;;  %v2622_v63 = vor.u32 %v2905_v53, %v2619_v57 }
 0x1c9   : > { %1420 = vmatmul.bf16.gmra.mxu1 %v2502_v12  ;;  %1509 = vmatmul.bf16.gmra.mxu2 %v2506_v13  ;;  %v1934_v12 = vld [vmem:[%s3876_s24 + $0x20] sm:$0xff]  ;;  %v1933_v13 = vld [vmem:[%s3876_s24 + $0x18] sm:$0xff] }
 0x1ca   : > { %1957 = vmatpush.msrb.mxu0 %v1934_v12 }
 0x1cc   : > { %1598 = vmatmul.bf16.gmra.mxu3 %v2510_v14  ;;  %v2896_v14 = vld [vmem:[%s3865_s25 + $0xc4] sm:$0xf]  ;;  %1958 = vmatpush.msrb.mxu0 %v1933_v13 }
 0x1cd   : > { %v2582_v22 = vor.u32 %v2896_v14, %v2579_v15 }
 0x1ce   : > { %1959 = vmatpush.msrb.mxu0 %v1932_v26 }
 0x1cf   : > { %v1709_v8 = vpop.permute.xlu0 %1708 }
 0x1d0   : > { %1960 = vmatpush.msrb.mxu0 %v1931_v27 }
 0x1d2   : > { %1961 = vmatpush.msrb.mxu0 %v1930_v32 }
 0x1d9   : > { %1425 = vmatmul.bf16.gmra.mxu1 %v2518_v23  ;;  %1514 = vmatmul.bf16.gmra.mxu2 %v2522_v24  ;;  %v2586_v23 = vor.u32 %v2899_v17, %v2585_v16  ;;  %v2908_v16 = vld [vmem:[%s3865_s25 + $0x124] sm:$0xf]  ;;  %v2627_v17 = vld [vmem:[%s3865_s25 + $0x130] sm:$0xf0] }
 0x1da   : > { %v2630_v32 = vor.u32 %v2908_v16, %v2627_v17 }
 0x1dc   : > { %1603 = vmatmul.bf16.gmra.mxu3 %v2526_v25  ;;  %v2590_v25 = vor.u32 %v2897_v18, %v2587_v19  ;;  %v2633_v18 = vld [vmem:[%s3865_s25 + $0x128] sm:$0xf]  ;;  %v2911_v19 = vld [vmem:[%s3865_s25 + $0x134] sm:$0xf0] }
 0x1dd   : > { %v2634_v33 = vor.u32 %v2911_v19, %v2633_v18 }
 0x1e9   : > { %1430 = vmatmul.bf16.gmra.mxu1 %v2534_v34  ;;  %1519 = vmatmul.bf16.gmra.mxu2 %v2538_v35  ;;  %v2601_v34 = vld [vmem:[%s3865_s25 + $0xe8] sm:$0xf]  ;;  %v2903_v35 = vld [vmem:[%s3865_s25 + $0xf4] sm:$0xf0] }
 0x1ea   : > { %v2602_v41 = vor.u32 %v2903_v35, %v2601_v34 }
 0x1ec   : > { %1608 = vmatmul.bf16.gmra.mxu3 %v2542_v37  ;;  %v2603_v37 = vld [vmem:[%s3865_s25 + $0xf8] sm:$0xf0] }
 0x1ed   : > { %v2606_v43 = vor.u32 %v2901_v36, %v2603_v37  ;;  %v1714_v37 = vpop.permute.xlu0 %1713 }
 0x1f6   : > { %v4041_v50 = vpop.f32.mrf.mxu1 }
 0x1f8   : > { %v1327_v45 = vpop.f32.mrf.mxu0 }
 0x1f9   : > { %1435 = vmatmul.bf16.gmra.mxu1 %v2550_v48  ;;  %1524 = vmatmul.bf16.gmra.mxu2 %v2554_v49  ;;  %v2904_v48 = vld [vmem:[%s3865_s25 + $0x104] sm:$0xf]  ;;  %v2611_v49 = vld [vmem:[%s3865_s25 + $0x110] sm:$0xf0] }
 0x1fa   : > { %v2614_v60 = vor.u32 %v2904_v48, %v2611_v49 }
 0x1fc   : > { %1613 = vmatmul.bf16.gmra.mxu3 %v2558_v51  ;;  %v4045_v54 = vpop.f32.mrf.mxu2  ;;  %v2617_v51 = vld [vmem:[%s3865_s25 + $0x108] sm:$0xf] }
 0x1fd   : > { %v2618_v61 = vor.u32 %v2907_v52, %v2617_v51  ;;  %v1719_v51 = vpop.permute.xlu1 %1718 }
 0x1fe   : > { %v4049_v56 = vpop.f32.mrf.mxu1 }
 0x1ff   : > { %v4047_v55 = vpop.f32.mrf.mxu3 }
 0x200   : > { %v1329_v0 = vpop.f32.mrf.mxu0 }
 0x204   : > { %v4059_v1 = vpop.f32.mrf.mxu2 }
 0x205   : > { %v1724_v18 = vpop.permute.xlu1 %1723 }
 0x206   : > { %v4063_v5 = vpop.f32.mrf.mxu1 }
 0x207   : > { %v4061_v2 = vpop.f32.mrf.mxu3 }
 0x208   : > { %v1332_v14 = vpop.f32.mrf.mxu0 }
 0x209   : > { %1440 = vmatmul.bf16.gmra.mxu1 %v2566_v3  ;;  %1529 = vmatmul.bf16.gmra.mxu2 %v2570_v4 }
 0x20c   : > { %1618 = vmatmul.bf16.gmra.mxu3 %v2574_v6  ;;  %v4067_v9 = vpop.f32.mrf.mxu2 }
 0x20e   : > { %v4071_v11 = vpop.f32.mrf.mxu1 }
 0x20f   : > { %v4069_v10 = vpop.f32.mrf.mxu3 }
 0x214   : > { %v4081_v20 = vpop.f32.mrf.mxu2 }
 0x216   : > { %v4085_v24 = vpop.f32.mrf.mxu1 }
 0x217   : > { %v4083_v21 = vpop.f32.mrf.mxu3 }
 0x219   : > { %1445 = vmatmul.bf16.gmra.mxu1 %v2582_v22  ;;  %1534 = vmatmul.bf16.gmra.mxu2 %v2586_v23  ;;  %v2909_v23 = vld [vmem:[%s3865_s25 + $0x12c] sm:$0xf] }
 0x21c   : > { %1623 = vmatmul.bf16.gmra.mxu3 %v2590_v25  ;;  %v4089_v28 = vpop.f32.mrf.mxu2  ;;  %v2635_v25 = vld [vmem:[%s3865_s25 + $0x138] sm:$0xf0] }
 0x21d   : > { %v2638_v35 = vor.u32 %v2909_v23, %v2635_v25  ;;  %v1729_v25 = vpop.permute.xlu2 %1728 }
 0x21e   : > { %v4093_v30 = vpop.f32.mrf.mxu1 }
 0x21f   : > { %v4091_v29 = vpop.f32.mrf.mxu3 }
 0x224   : > { %v4102_v38 = vpop.f32.mrf.mxu2 }
 0x226   : > { %v4106_v42 = vpop.f32.mrf.mxu1 }
 0x227   : > { %v4104_v39 = vpop.f32.mrf.mxu3 }
 0x229   : > { %1450 = vmatmul.bf16.gmra.mxu1 %v2598_v40  ;;  %1539 = vmatmul.bf16.gmra.mxu2 %v2602_v41 }
 0x22c   : > { %1628 = vmatmul.bf16.gmra.mxu3 %v2606_v43  ;;  %v4108_v44 = vpop.f32.mrf.mxu2  ;;  %v1334_v43 = vpop.f32.mrf.mxu0 }
 0x22e   : > { %v4112_v47 = vpop.f32.mrf.mxu1 }
 0x22f   : > { %v4110_v46 = vpop.f32.mrf.mxu3 }
 0x234   : > { %v4120_v58 = vpop.f32.mrf.mxu2 }
 0x236   : > { %v1416_v62 = vpop.f32.mrf.mxu1 }
 0x237   : > { %v4122_v59 = vpop.f32.mrf.mxu3  ;;  %v1417_v3 = vadd.f32 %v1416_v62, %v1327_v45  ;;  %v2649_v62 = vld [vmem:[%s3865_s25 + $0x148] sm:$0xf] }
 0x239   : > { %1455 = vmatmul.bf16.gmra.mxu1 %v2614_v60  ;;  %1544 = vmatmul.bf16.gmra.mxu2 %v2618_v61  ;;  %v2912_v60 = vld [vmem:[%s3865_s25 + $0x144] sm:$0xf]  ;;  %v2643_v61 = vld [vmem:[%s3865_s25 + $0x150] sm:$0xf0] }
 0x23c   : > { %1633 = vmatmul.bf16.gmra.mxu3 %v2622_v63  ;;  %v1505_v4 = vpop.f32.mrf.mxu2  ;;  %v2915_v63 = vld [vmem:[%s3865_s25 + $0x154] sm:$0xf0] }
 0x23d   : > { %v1506_v6 = vadd.f32 %v1505_v4, %v1417_v3  ;;  %v2913_v3 = vld [vmem:[%s3865_s25 + $0x14c] sm:$0xf]  ;;  %v2651_v4 = vld [vmem:[%s3865_s25 + $0x158] sm:$0xf0] }
 0x23e   : > { %v1418_v12 = vpop.f32.mrf.mxu1  ;;  %v2654_v16 = vor.u32 %v2913_v3, %v2651_v4 }
 0x23f   : > { %v1594_v7 = vpop.f32.mrf.mxu3  ;;  %v1419_v22 = vadd.f32 %v1418_v12, %v1329_v0 }
 0x240   : > { %v1595_v13 = vadd.f32 %v1594_v7, %v1506_v6  ;;  %v1337_v6 = vpop.f32.mrf.mxu0 }
 0x242   : > { %v1866_v15 = vmul.f32 %v1709_v8, %v1595_v13  ;;  %v2646_v13 = vor.u32 %v2912_v60, %v2643_v61 }
 0x244   : > { %1962 = vmatmul.f32.vlgmr.msrb.gmra.mxu0 %v1866_v15  ;;  %v1507_v26 = vpop.f32.mrf.mxu2 }
 0x245   : > { %v1508_v27 = vadd.f32 %v1507_v26, %v1419_v22 }
 0x246   : > { %v1421_v34 = vpop.f32.mrf.mxu1 }
 0x247   : > { %v1596_v31 = vpop.f32.mrf.mxu3  ;;  %v1422_v40 = vadd.f32 %v1421_v34, %v1332_v14  ;;  %v2650_v14 = vor.u32 %v2915_v63, %v2649_v62  ;;  %v1734_v62 = vpop.permute.xlu2 %1733 }
 0x248   : > { %v1597_v36 = vadd.f32 %v1596_v31, %v1508_v27  ;;  %v1339_v31 = vpop.f32.mrf.mxu0 }
 0x249   : > { %1460 = vmatmul.bf16.gmra.mxu1 %v2630_v32  ;;  %1549 = vmatmul.bf16.gmra.mxu2 %v2634_v33 }
 0x24a   : > { %v1867_v41 = vmul.f32 %v1714_v37, %v1597_v36  ;;  %v2659_v36 = vld [vmem:[%s3865_s25 + $0x170] sm:$0xf0]  ;;  %v2665_v37 = vld [vmem:[%s3865_s25 + $0x168] sm:$0xf] }
 0x24c   : > { %1638 = vmatmul.bf16.gmra.mxu3 %v2638_v35  ;;  %1965 = vmatmul.f32.gmra.mxu0 %v1867_v41  ;;  %v1510_v45 = vpop.f32.mrf.mxu2  ;;  %v2916_v35 = vld [vmem:[%s3865_s25 + $0x164] sm:$0xf] }
 0x24d   : > { %v1511_v48 = vadd.f32 %v1510_v45, %v1422_v40  ;;  %v2919_v40 = vld [vmem:[%s3865_s25 + $0x174] sm:$0xf0]  ;;  %v2667_v45 = vld [vmem:[%s3865_s25 + $0x178] sm:$0xf0] }
 0x24e   : > { %v1423_v52 = vpop.f32.mrf.mxu1 }
 0x24f   : > { %v1599_v49 = vpop.f32.mrf.mxu3  ;;  %v1424_v0 = vadd.f32 %v1423_v52, %v1334_v43  ;;  %v2917_v43 = vld [vmem:[%s3865_s25 + $0x16c] sm:$0xf]  ;;  %v2662_v52 = vor.u32 %v2916_v35, %v2659_v36 }
 0x250   : > { %v1600_v53 = vadd.f32 %v1599_v49, %v1511_v48  ;;  %v2670_v60 = vor.u32 %v2917_v43, %v2667_v45  ;;  %v1342_v63 = vpop.f32.mrf.mxu0 }
 0x252   : > { %v1868_v57 = vmul.f32 %v1719_v51, %v1600_v53  ;;  %v2666_v53 = vor.u32 %v2919_v40, %v2665_v37  ;;  %v1744_v37 = vpop.permute.xlu1 %1743 }
 0x254   : > { %1968 = vmatmul.f32.gmra.mxu0 %v1868_v57  ;;  %v1512_v7 = vpop.f32.mrf.mxu2 }
 0x255   : > { %v1513_v8 = vadd.f32 %v1512_v7, %v1424_v0 }
 0x256   : > { %v1426_v15 = vpop.f32.mrf.mxu1 }
 0x257   : > { %v1601_v12 = vpop.f32.mrf.mxu3  ;;  %v1427_v19 = vadd.f32 %v1426_v15, %v1337_v6  ;;  %v2920_v15 = vld [vmem:[%s3865_s25 + $0x184] sm:$0xf] }
 0x258   : > { %v1602_v17 = vadd.f32 %v1601_v12, %v1513_v8 }
 0x259   : > { %1465 = vmatmul.bf16.gmra.mxu1 %v2646_v13  ;;  %1554 = vmatmul.bf16.gmra.mxu2 %v2650_v14  ;;  %v1739_v13 = vpop.permute.xlu0 %1738 }
 0x25a   : > { %v1869_v22 = vmul.f32 %v1724_v18, %v1602_v17  ;;  %v2675_v17 = vld [vmem:[%s3865_s25 + $0x190] sm:$0xf0]  ;;  %v2681_v18 = vld [vmem:[%s3865_s25 + $0x188] sm:$0xf] }
 0x25c   : > { %1643 = vmatmul.bf16.gmra.mxu3 %v2654_v16  ;;  %1971 = vmatmul.f32.gmra.mxu0 %v1869_v22  ;;  %v1515_v23 = vpop.f32.mrf.mxu2  ;;  %v1344_v16 = vpop.f32.mrf.mxu0 }
 0x25d   : > { %v1516_v26 = vadd.f32 %v1515_v23, %v1427_v19  ;;  %v2923_v19 = vld [vmem:[%s3865_s25 + $0x194] sm:$0xf0]  ;;  %v2921_v23 = vld [vmem:[%s3865_s25 + $0x18c] sm:$0xf] }
 0x25e   : > { %v1428_v32 = vpop.f32.mrf.mxu1 }
 0x25f   : > { %v1604_v27 = vpop.f32.mrf.mxu3  ;;  %v1429_v41 = vadd.f32 %v1428_v32, %v1339_v31  ;;  %v2678_v32 = vor.u32 %v2920_v15, %v2675_v17 }
 0x260   : > { %v1605_v33 = vadd.f32 %v1604_v27, %v1516_v26 }
 0x261   : > { %v1754_v15 = vpop.permute.xlu0 %1753 }
 0x262   : > { %v1870_v34 = vmul.f32 %v1729_v25, %v1605_v33  ;;  %v2683_v25 = vld [vmem:[%s3865_s25 + $0x198] sm:$0xf0]  ;;  %v2682_v33 = vor.u32 %v2923_v19, %v2681_v18 }
 0x263   : > { %v2686_v35 = vor.u32 %v2921_v23, %v2683_v25  ;;  %v1759_v25 = vpop.permute.xlu1 %1758 }
 0x264   : > { %1974 = vmatmul.f32.gmra.mxu0 %v1870_v34  ;;  %v1517_v48 = vpop.f32.mrf.mxu2 }
 0x265   : > { %v1518_v49 = vadd.f32 %v1517_v48, %v1429_v41 }
 0x266   : > { %v1431_v57 = vpop.f32.mrf.mxu1 }
 0x267   : > { %v1606_v51 = vpop.f32.mrf.mxu3  ;;  %v1432_v0 = vadd.f32 %v1431_v57, %v1342_v63  ;;  %v2924_v57 = vld [vmem:[%s3865_s25 + $0x1a4] sm:$0xf] }
 0x268   : > { %v1607_v61 = vadd.f32 %v1606_v51, %v1518_v49 }
 0x269   : > { %1470 = vmatmul.bf16.gmra.mxu1 %v2662_v52  ;;  %1559 = vmatmul.bf16.gmra.mxu2 %v2666_v53  ;;  %v1749_v52 = vpop.permute.xlu2 %1748 }
 0x26a   : > { %v1871_v3 = vmul.f32 %v1734_v62, %v1607_v61  ;;  %v2697_v61 = vld [vmem:[%s3865_s25 + $0x1a8] sm:$0xf]  ;;  %v2927_v62 = vld [vmem:[%s3865_s25 + $0x1b4] sm:$0xf0] }
 0x26c   : > { %1648 = vmatmul.bf16.gmra.mxu3 %v2670_v60  ;;  %1977 = vmatmul.f32.gmra.mxu0 %v1871_v3  ;;  %v1520_v4 = vpop.f32.mrf.mxu2  ;;  %v2691_v60 = vld [vmem:[%s3865_s25 + $0x1b0] sm:$0xf0]  ;;  %v2699_v3 = vld [vmem:[%s3865_s25 + $0x1b8] sm:$0xf0] }
 0x26d   : > { %v1521_v6 = vadd.f32 %v1520_v4, %v1432_v0  ;;  %v2925_v0 = vld [vmem:[%s3865_s25 + $0x1ac] sm:$0xf] }
 0x26e   : > { %v1433_v8 = vpop.f32.mrf.mxu1 }
 0x26f   : > { %v1609_v7 = vpop.f32.mrf.mxu3  ;;  %v1434_v22 = vadd.f32 %v1433_v8, %v1344_v16  ;;  %v2698_v8 = vor.u32 %v2927_v62, %v2697_v61 }
 0x270   : > { %v1610_v12 = vadd.f32 %v1609_v7, %v1521_v6  ;;  %v2694_v7 = vor.u32 %v2924_v57, %v2691_v60 }
 0x272   : > { %v1872_v14 = vmul.f32 %v1739_v13, %v1610_v12  ;;  %v2702_v13 = vor.u32 %v2925_v0, %v2699_v3  ;;  %v2932_v3 = vld [vmem:[%s3865_s25 + $0x1e4] sm:$0xf] }
 0x274   : > { %1980 = vmatmul.f32.gmra.mxu0 %v1872_v14  ;;  %v1522_v26 = vpop.f32.mrf.mxu2 }
 0x275   : > { %v1523_v27 = vadd.f32 %v1522_v26, %v1434_v22 }
 0x276   : > { %v1436_v34 = vpop.f32.mrf.mxu1 }
 0x277   : > { %v1611_v31 = vpop.f32.mrf.mxu3  ;;  %v1437_v41 = vadd.f32 %v1436_v34, %v4041_v50 }
 0x278   : > { %v1612_v36 = vadd.f32 %v1611_v31, %v1523_v27  ;;  %v2928_v27 = vld [vmem:[%s3865_s25 + $0x1c4] sm:$0xf]  ;;  %v2707_v31 = vld [vmem:[%s3865_s25 + $0x1d0] sm:$0xf0] }
 0x279   : > { %1475 = vmatmul.bf16.gmra.mxu1 %v2678_v32  ;;  %1564 = vmatmul.bf16.gmra.mxu2 %v2682_v33  ;;  %v2713_v32 = vld [vmem:[%s3865_s25 + $0x1c8] sm:$0xf]  ;;  %v2931_v33 = vld [vmem:[%s3865_s25 + $0x1d4] sm:$0xf0] }
 0x27a   : > { %v1873_v40 = vmul.f32 %v1744_v37, %v1612_v36  ;;  %v2715_v36 = vld [vmem:[%s3865_s25 + $0x1d8] sm:$0xf0] }
 0x27c   : > { %1653 = vmatmul.bf16.gmra.mxu3 %v2686_v35  ;;  %1983 = vmatmul.f32.gmra.mxu0 %v1873_v40  ;;  %v1525_v43 = vpop.f32.mrf.mxu2  ;;  %v2929_v35 = vld [vmem:[%s3865_s25 + $0x1cc] sm:$0xf] }
 0x27d   : > { %v1526_v45 = vadd.f32 %v1525_v43, %v1437_v41  ;;  %v2710_v41 = vor.u32 %v2928_v27, %v2707_v31  ;;  %v2714_v43 = vor.u32 %v2931_v33, %v2713_v32 }
 0x27e   : > { %v1438_v49 = vpop.f32.mrf.mxu1 }
 0x27f   : > { %v1614_v48 = vpop.f32.mrf.mxu3  ;;  %v1439_v63 = vadd.f32 %v1438_v49, %v4049_v56 }
 0x280   : > { %v1615_v51 = vadd.f32 %v1614_v48, %v1526_v45  ;;  %v2718_v48 = vor.u32 %v2929_v35, %v2715_v36 }
 0x282   : > { %v1874_v53 = vmul.f32 %v1749_v52, %v1615_v51  ;;  %v1764_v51 = vpop.permute.xlu2 %1763 }
 0x284   : > { %1986 = vmatmul.f32.gmra.mxu0 %v1874_v53  ;;  %v1527_v4 = vpop.f32.mrf.mxu2 }
 0x285   : > { %v1528_v50 = vadd.f32 %v1527_v4, %v1439_v63  ;;  %v1769_v63 = vpop.permute.xlu0 %1768  ;;  %v2723_v4 = vld [vmem:[%s3865_s25 + $0x1f0] sm:$0xf0] }
 0x286   : > { %v1441_v12 = vpop.f32.mrf.mxu1 }
 0x287   : > { %v1616_v6 = vpop.f32.mrf.mxu3  ;;  %v1442_v56 = vadd.f32 %v1441_v12, %v4063_v5  ;;  %v2731_v12 = vld [vmem:[%s3865_s25 + $0x1f8] sm:$0xf0] }
 0x288   : > { %v1617_v14 = vadd.f32 %v1616_v6, %v1528_v50  ;;  %v2729_v50 = vld [vmem:[%s3865_s25 + $0x1e8] sm:$0xf]  ;;  %v2935_v6 = vld [vmem:[%s3865_s25 + $0x1f4] sm:$0xf0] }
 0x289   : > { %1480 = vmatmul.bf16.gmra.mxu1 %v2694_v7  ;;  %1569 = vmatmul.bf16.gmra.mxu2 %v2698_v8  ;;  %v2933_v8 = vld [vmem:[%s3865_s25 + $0x1ec] sm:$0xf] }
 0x28a   : > { %v1875_v16 = vmul.f32 %v1754_v15, %v1617_v14  ;;  %v2726_v15 = vor.u32 %v2932_v3, %v2723_v4  ;;  %v1779_v32 = vpop.permute.xlu2 %1778 }
 0x28c   : > { %1658 = vmatmul.bf16.gmra.mxu3 %v2702_v13  ;;  %1989 = vmatmul.f32.gmra.mxu0 %v1875_v16  ;;  %v1530_v17 = vpop.f32.mrf.mxu2  ;;  %v2730_v16 = vor.u32 %v2935_v6, %v2729_v50 }
 0x28d   : > { %v1531_v18 = vadd.f32 %v1530_v17, %v1442_v56  ;;  %v2734_v17 = vor.u32 %v2933_v8, %v2731_v12 }
 0x28e   : > { %v1443_v22 = vpop.f32.mrf.mxu1 }
 0x28f   : > { %v1619_v19 = vpop.f32.mrf.mxu3  ;;  %v1444_v34 = vadd.f32 %v1443_v22, %v4071_v11 }
 0x290   : > { %v1620_v23 = vadd.f32 %v1619_v19, %v1531_v18  ;;  %v1774_v19 = vpop.permute.xlu1 %1773 }
 0x292   : > { %v1876_v26 = vmul.f32 %v1759_v25, %v1620_v23  ;;  %v1794_v50 = vpop.permute.xlu2 %1793 }
 0x294   : > { %1992 = vmatmul.f32.gmra.mxu0 %v1876_v26  ;;  %v1532_v37 = vpop.f32.mrf.mxu2 }
 0x295   : > { %v1533_v5 = vadd.f32 %v1532_v37, %v1444_v34 }
 0x296   : > { %v1446_v45 = vpop.f32.mrf.mxu1 }
 0x297   : > { %v1621_v40 = vpop.f32.mrf.mxu3  ;;  %v1447_v11 = vadd.f32 %v1446_v45, %v4085_v24 }
 0x298   : > { %v1622_v49 = vadd.f32 %v1621_v40, %v1533_v5 }
 0x299   : > { %1485 = vmatmul.bf16.gmra.mxu1 %v2710_v41  ;;  %1574 = vmatmul.bf16.gmra.mxu2 %v2714_v43  ;;  %v1784_v41 = vpop.permute.xlu0 %1783 }
 0x29a   : > { %v1877_v52 = vmul.f32 %v1764_v51, %v1622_v49 }
 0x29c   : > { %1663 = vmatmul.bf16.gmra.mxu3 %v2718_v48  ;;  %1995 = vmatmul.f32.gmra.mxu0 %v1877_v52  ;;  %v1535_v53 = vpop.f32.mrf.mxu2  ;;  %v1898_v52 = vld [vmem:[#allocation2 + $0xb0] sm:$0xff] }
 0x29d   : > { %v1536_v57 = vadd.f32 %v1535_v53, %v1447_v11  ;;  %v1789_v53 = vpop.permute.xlu1 %1788 }
 0x29e   : > { %v1448_v61 = vpop.f32.mrf.mxu1 }
 0x29f   : > { %v1624_v60 = vpop.f32.mrf.mxu3  ;;  %v1449_v7 = vadd.f32 %v1448_v61, %v4093_v30 }
 0x2a0   : > { %v1625_v62 = vadd.f32 %v1624_v60, %v1536_v57 }
 0x2a2   : > { %v1878_v0 = vmul.f32 %v1769_v63, %v1625_v62 }
 0x2a4   : > { %1998 = vmatmul.f32.gmra.mxu0 %v1878_v0  ;;  %v1537_v13 = vpop.f32.mrf.mxu2 }
 0x2a5   : > { %v1538_v24 = vadd.f32 %v1537_v13, %v1449_v7 }
 0x2a6   : > { %v1451_v56 = vpop.f32.mrf.mxu1 }
 0x2a7   : > { %v1626_v14 = vpop.f32.mrf.mxu3  ;;  %v1452_v23 = vadd.f32 %v1451_v56, %v4106_v42  ;;  %v1799_v56 = vpop.permute.xlu0 %1798 }
 0x2a8   : > { %v1627_v18 = vadd.f32 %v1626_v14, %v1538_v24 }
 0x2a9   : > { %1490 = vmatmul.bf16.gmra.mxu1 %v2726_v15  ;;  %1579 = vmatmul.bf16.gmra.mxu2 %v2730_v16  ;;  %v1900_v15 = vld [vmem:[#allocation2 + $0xd8] sm:$0xff] }
 0x2aa   : > { %v1879_v22 = vmul.f32 %v1774_v19, %v1627_v18 }
 0x2ac   : > { %1668 = vmatmul.bf16.gmra.mxu3 %v2734_v17  ;;  %2001 = vmatmul.f32.gmra.mxu0 %v1879_v22  ;;  %v1540_v30 = vpop.f32.mrf.mxu2 }
 0x2ad   : > { %v1541_v25 = vadd.f32 %v1540_v30, %v1452_v23 }
 0x2ae   : > { %v1453_v27 = vpop.f32.mrf.mxu1 }
 0x2af   : > { %v1629_v26 = vpop.f32.mrf.mxu3  ;;  %v1454_v34 = vadd.f32 %v1453_v27, %v4112_v47 }
 0x2b0   : > { %v1630_v31 = vadd.f32 %v1629_v26, %v1541_v25  ;;  %v1901_v26 = vld [vmem:[#allocation2 + $0x18] sm:$0xff] }
 0x2b2   : > { %v1880_v33 = vmul.f32 %v1779_v32, %v1630_v31  ;;  %v1804_v31 = vpop.permute.xlu1 %1803 }
 0x2b4   : > { %2004 = vmatmul.f32.gmra.mxu0 %v1880_v33  ;;  %v1542_v35 = vpop.f32.mrf.mxu2 }
 0x2b5   : > { %v1543_v36 = vadd.f32 %v1542_v35, %v1454_v34 }
 0x2b6   : > { %v1456_v5 = vpop.f32.mrf.mxu1 }
 0x2b7   : > { %v1631_v37 = vpop.f32.mrf.mxu3  ;;  %v1457_v42 = vadd.f32 %v1456_v5, %v4045_v54  ;;  %v1899_v54 = vld [vmem:[#allocation2] sm:$0xff] }
 0x2b8   : > { %v1632_v40 = vadd.f32 %v1631_v37, %v1543_v36 }
 0x2ba   : > { %v1881_v43 = vmul.f32 %v1784_v41, %v1632_v40  ;;  %v1902_v40 = vld [vmem:[#allocation2 + $0x50] sm:$0xff] }
 0x2bc   : > { %2007 = vmatmul.f32.gmra.mxu0 %v1881_v43  ;;  %v1545_v45 = vpop.f32.mrf.mxu2  ;;  %v1809_v43 = vpop.permute.xlu2 %1808 }
 0x2bd   : > { %v1546_v48 = vadd.f32 %v1545_v45, %v1457_v42 }
 0x2be   : > { %v1458_v51 = vpop.f32.mrf.mxu1 }
 0x2bf   : > { %v1634_v49 = vpop.f32.mrf.mxu3  ;;  %v1459_v61 = vadd.f32 %v1458_v51, %v4059_v1 }
 0x2c0   : > { %v1635_v11 = vadd.f32 %v1634_v49, %v1546_v48 }
 0x2c1   : > { %v1963_v57 = vpop.f32.mrf.mxu0 }
 0x2c2   : > { %v1882_v47 = vmul.f32 %v1789_v53, %v1635_v11  ;;  %v2059_v60 = vadd.f32 %v1963_v57, %v1898_v52  ;;  %v1903_v53 = vld [vmem:[#allocation2 + $0x68] sm:$0xff] }
 0x2c4   : > { %2091 = vst [vmem:[#allocation2 + $0xb0] sm:$0xff] %v2059_v60  ;;  %2010 = vmatmul.f32.gmra.mxu0 %v1882_v47  ;;  %v1547_v62 = vpop.f32.mrf.mxu2  ;;  %v1814_v47 = vpop.permute.xlu0 %1813 }
 0x2c5   : > { %v1548_v63 = vadd.f32 %v1547_v62, %v1459_v61 }
 0x2c6   : > { %v1461_v3 = vpop.f32.mrf.mxu1 }
 0x2c7   : > { %v1636_v0 = vpop.f32.mrf.mxu3  ;;  %v1462_v12 = vadd.f32 %v1461_v3, %v4067_v9 }
 0x2c8   : > { %v1637_v4 = vadd.f32 %v1636_v0, %v1548_v63 }
 0x2c9   : > { %v1966_v6 = vpop.f32.mrf.mxu0 }
 0x2ca   : > { %v1883_v7 = vmul.f32 %v1794_v50, %v1637_v4  ;;  %v2060_v8 = vadd.f32 %v1966_v6, %v1899_v54  ;;  %v1904_v4 = vld [vmem:[#allocation2 + $0x30] sm:$0xff]  ;;  %v1819_v6 = vpop.permute.xlu1 %1818 }
 0x2cc   : > { %2092 = vst [vmem:[#allocation2] sm:$0xff] %v2060_v8  ;;  %2013 = vmatmul.f32.gmra.mxu0 %v1883_v7  ;;  %v1550_v13 = vpop.f32.mrf.mxu2 }
 0x2cd   : > { %v1551_v24 = vadd.f32 %v1550_v13, %v1462_v12 }
 0x2ce   : > { %v1463_v1 = vpop.f32.mrf.mxu1 }
 0x2cf   : > { %v1639_v14 = vpop.f32.mrf.mxu3  ;;  %v1464_v22 = vadd.f32 %v1463_v1, %v4081_v20 }
 0x2d0   : > { %v1640_v16 = vadd.f32 %v1639_v14, %v1551_v24 }
 0x2d1   : > { %v1969_v17 = vpop.f32.mrf.mxu0 }
 0x2d2   : > { %v1884_v18 = vmul.f32 %v1799_v56, %v1640_v16  ;;  %v2061_v19 = vadd.f32 %v1969_v17, %v1900_v15  ;;  %v1905_v15 = vld [vmem:[#allocation2 + $0x48] sm:$0xff]  ;;  %v1824_v56 = vpop.permute.xlu2 %1823 }
 0x2d4   : > { %2093 = vst [vmem:[#allocation2 + $0xd8] sm:$0xff] %v2061_v19  ;;  %2016 = vmatmul.f32.gmra.mxu0 %v1884_v18  ;;  %v1552_v23 = vpop.f32.mrf.mxu2 }
 0x2d5   : > { %v1553_v30 = vadd.f32 %v1552_v23, %v1464_v22 }
 0x2d6   : > { %v1466_v9 = vpop.f32.mrf.mxu1 }
 0x2d7   : > { %v1641_v25 = vpop.f32.mrf.mxu3  ;;  %v1467_v35 = vadd.f32 %v1466_v9, %v4089_v28  ;;  %v1906_v9 = vld [vmem:[#allocation2 + $0x80] sm:$0xff] }
 0x2d8   : > { %v1642_v27 = vadd.f32 %v1641_v25, %v1553_v30 }
 0x2d9   : > { %v1972_v32 = vpop.f32.mrf.mxu0 }
 0x2da   : > { %v1885_v33 = vmul.f32 %v1804_v31, %v1642_v27  ;;  %v2062_v34 = vadd.f32 %v1972_v32, %v1901_v26  ;;  %v1829_v27 = vpop.permute.xlu0 %1828 }
 0x2dc   : > { %2094 = vst [vmem:[#allocation2 + $0x18] sm:$0xff] %v2062_v34  ;;  %2019 = vmatmul.f32.gmra.mxu0 %v1885_v33  ;;  %v1555_v36 = vpop.f32.mrf.mxu2 }
 0x2dd   : > { %v1556_v37 = vadd.f32 %v1555_v36, %v1467_v35 }
 0x2de   : > { %v1468_v20 = vpop.f32.mrf.mxu1 }
 0x2df   : > { %v1644_v5 = vpop.f32.mrf.mxu3  ;;  %v1469_v49 = vadd.f32 %v1468_v20, %v4102_v38 }
 0x2e0   : > { %v1645_v41 = vadd.f32 %v1644_v5, %v1556_v37  ;;  %v1907_v5 = vld [vmem:[#allocation2 + $0x88] sm:$0xff] }
 0x2e1   : > { %v1975_v42 = vpop.f32.mrf.mxu0 }
 0x2e2   : > { %v1886_v45 = vmul.f32 %v1809_v43, %v1645_v41  ;;  %v2063_v48 = vadd.f32 %v1975_v42, %v1902_v40  ;;  %v1834_v40 = vpop.permute.xlu1 %1833 }
 0x2e4   : > { %2095 = vst [vmem:[#allocation2 + $0x50] sm:$0xff] %v2063_v48  ;;  %2022 = vmatmul.f32.gmra.mxu0 %v1886_v45  ;;  %v1557_v51 = vpop.f32.mrf.mxu2 }
 0x2e5   : > { %v1558_v52 = vadd.f32 %v1557_v51, %v1469_v49 }
 0x2e6   : > { %v1471_v28 = vpop.f32.mrf.mxu1 }
 0x2e7   : > { %v1646_v11 = vpop.f32.mrf.mxu3  ;;  %v1472_v63 = vadd.f32 %v1471_v28, %v4108_v44  ;;  %v1839_v28 = vpop.permute.xlu2 %1838 }
 0x2e8   : > { %v1647_v57 = vadd.f32 %v1646_v11, %v1558_v52  ;;  %v1908_v52 = vld [vmem:[#allocation2 + $0xe8] sm:$0xff] }
 0x2e9   : > { %v1978_v60 = vpop.f32.mrf.mxu0 }
 0x2ea   : > { %v1887_v61 = vmul.f32 %v1814_v47, %v1647_v57  ;;  %v2064_v62 = vadd.f32 %v1978_v60, %v1903_v53 }
 0x2ec   : > { %2096 = vst [vmem:[#allocation2 + $0x68] sm:$0xff] %v2064_v62  ;;  %2025 = vmatmul.f32.gmra.mxu0 %v1887_v61  ;;  %v1560_v0 = vpop.f32.mrf.mxu2 }
 0x2ed   : > { %v1561_v3 = vadd.f32 %v1560_v0, %v1472_v63  ;;  %v1909_v0 = vld [vmem:[#allocation2 + $0xb8] sm:$0xff] }
 0x2ee   : > { %v1473_v38 = vpop.f32.mrf.mxu1 }
 0x2ef   : > { %v1649_v54 = vpop.f32.mrf.mxu3  ;;  %v1474_v13 = vadd.f32 %v1473_v38, %v4120_v58 }
 0x2f0   : > { %v1650_v50 = vadd.f32 %v1649_v54, %v1561_v3  ;;  %v1844_v54 = vpop.permute.xlu0 %1843 }
 0x2f1   : > { %v1981_v7 = vpop.f32.mrf.mxu0 }
 0x2f2   : > { %v1888_v8 = vmul.f32 %v1819_v6, %v1650_v50  ;;  %v2065_v12 = vadd.f32 %v1981_v7, %v1904_v4 }
 0x2f4   : > { %2097 = vst [vmem:[#allocation2 + $0x30] sm:$0xff] %v2065_v12  ;;  %2028 = vmatmul.f32.gmra.mxu0 %v1888_v8  ;;  %v1562_v24 = vpop.f32.mrf.mxu2 }
 0x2f5   : > { %v1563_v14 = vadd.f32 %v1562_v24, %v1474_v13  ;;  %v1910_v13 = vld [vmem:[#allocation2 + $0x60] sm:$0xff] }
 0x2f6   : > { %v1476_v44 = vpop.f32.mrf.mxu1 }
 0x2f7   : > { %v1651_v1 = vpop.f32.mrf.mxu3  ;;  %v1477_v22 = vadd.f32 %v1476_v44, %v4047_v55 }
 0x2f8   : > { %v1652_v16 = vadd.f32 %v1651_v1, %v1563_v14  ;;  %v1849_v14 = vpop.permute.xlu1 %1848 }
 0x2f9   : > { %v1984_v17 = vpop.f32.mrf.mxu0 }
 0x2fa   : > { %v1889_v18 = vmul.f32 %v1824_v56, %v1652_v16  ;;  %v2066_v19 = vadd.f32 %v1984_v17, %v1905_v15 }
 0x2fc   : > { %2098 = vst [vmem:[#allocation2 + $0x48] sm:$0xff] %v2066_v19  ;;  %2031 = vmatmul.f32.gmra.mxu0 %v1889_v18  ;;  %v1565_v23 = vpop.f32.mrf.mxu2  ;;  %v1911_v19 = vld [vmem:[#allocation2 + $0xf0] sm:$0xff] }
 0x2fd   : > { %v1566_v30 = vadd.f32 %v1565_v23, %v1477_v22  ;;  %v1854_v23 = vpop.permute.xlu2 %1853 }
 0x2fe   : > { %v1478_v58 = vpop.f32.mrf.mxu1 }
 0x2ff   : > { %v1654_v25 = vpop.f32.mrf.mxu3  ;;  %v1479_v34 = vadd.f32 %v1478_v58, %v4061_v2 }
 0x300   : > { %v1655_v26 = vadd.f32 %v1654_v25, %v1566_v30 }
 0x301   : > { %v1987_v31 = vpop.f32.mrf.mxu0 }
 0x302   : > { %v1890_v32 = vmul.f32 %v1829_v27, %v1655_v26  ;;  %v2067_v33 = vadd.f32 %v1987_v31, %v1906_v9 }
 0x304   : > { %2099 = vst [vmem:[#allocation2 + $0x80] sm:$0xff] %v2067_v33  ;;  %2034 = vmatmul.f32.gmra.mxu0 %v1890_v32  ;;  %v1567_v35 = vpop.f32.mrf.mxu2  ;;  %v1859_v32 = vpop.permute.xlu0 %1858 }
 0x305   : > { %v1568_v36 = vadd.f32 %v1567_v35, %v1479_v34 }
 0x306   : > { %v1481_v55 = vpop.f32.mrf.mxu1 }
 0x307   : > { %v1656_v37 = vpop.f32.mrf.mxu3  ;;  %v1482_v45 = vadd.f32 %v1481_v55, %v4069_v10 }
 0x308   : > { %v1657_v20 = vadd.f32 %v1656_v37, %v1568_v36 }
 0x309   : > { %v1990_v41 = vpop.f32.mrf.mxu0 }
 0x30a   : > { %v1891_v43 = vmul.f32 %v1834_v40, %v1657_v20  ;;  %v2068_v42 = vadd.f32 %v1990_v41, %v1907_v5 }
 0x30c   : > { %2100 = vst [vmem:[#allocation2 + $0x88] sm:$0xff] %v2068_v42  ;;  %2037 = vmatmul.f32.gmra.mxu0 %v1891_v43  ;;  %v1570_v48 = vpop.f32.mrf.mxu2  ;;  %v1864_v43 = vpop.permute.xlu1 %1863 }
 0x30d   : > { %v1571_v49 = vadd.f32 %v1570_v48, %v1482_v45 }
 0x30e   : > { %v1483_v2 = vpop.f32.mrf.mxu1 }
 0x30f   : > { %v1659_v51 = vpop.f32.mrf.mxu3  ;;  %v1484_v60 = vadd.f32 %v1483_v2, %v4083_v21 }
 0x310   : > { %v1660_v11 = vadd.f32 %v1659_v51, %v1571_v49  ;;  %v1914_v49 = vld [vmem:[#allocation2 + $0x38] sm:$0xff] }
 0x311   : > { %v1993_v53 = vpop.f32.mrf.mxu0 }
 0x312   : > { %v1892_v57 = vmul.f32 %v1839_v28, %v1660_v11  ;;  %v2069_v47 = vadd.f32 %v1993_v53, %v1908_v52  ;;  %v1915_v52 = vld [vmem:[#allocation2 + $0x58] sm:$0xff]  ;;  %v1916_v28 = vld [vmem:[#allocation2 + $0x40] sm:$0xff] }
 0x314   : > { %2101 = vst [vmem:[#allocation2 + $0xe8] sm:$0xff] %v2069_v47  ;;  %2040 = vmatmul.f32.gmra.mxu0 %v1892_v57  ;;  %v1572_v61 = vpop.f32.mrf.mxu2  ;;  %v1917_v47 = vld [vmem:[#allocation2 + $0xc8] sm:$0xff] }
 0x315   : > { %v1573_v62 = vadd.f32 %v1572_v61, %v1484_v60 }
 0x316   : > { %v1486_v10 = vpop.f32.mrf.mxu1 }
 0x317   : > { %v1661_v63 = vpop.f32.mrf.mxu3  ;;  %v1487_v6 = vadd.f32 %v1486_v10, %v4091_v29 }
 0x318   : > { %v1662_v3 = vadd.f32 %v1661_v63, %v1573_v62  ;;  %v1918_v62 = vld [vmem:[#allocation2 + $0xe0] sm:$0xff] }
 0x319   : > { %v1996_v38 = vpop.f32.mrf.mxu0 }
 0x31a   : > { %v1893_v4 = vmul.f32 %v1844_v54, %v1662_v3  ;;  %v2070_v50 = vadd.f32 %v1996_v38, %v1909_v0  ;;  %v1919_v0 = vld [vmem:[#allocation2 + $0x90] sm:$0xff] }
 0x31b   : > { %v1920_v38 = vld [vmem:[#allocation2 + $0x70] sm:$0xff] }
 0x31c   : > { %2102 = vst [vmem:[#allocation2 + $0xb8] sm:$0xff] %v2070_v50  ;;  %2043 = vmatmul.f32.gmra.mxu0 %v1893_v4  ;;  %v1575_v7 = vpop.f32.mrf.mxu2 }
 0x31d   : > { %v1576_v8 = vadd.f32 %v1575_v7, %v1487_v6  ;;  %v1921_v6 = vld [vmem:[#allocation2 + $0xc0] sm:$0xff] }
 0x31e   : > { %v1488_v21 = vpop.f32.mrf.mxu1 }
 0x31f   : > { %v1664_v12 = vpop.f32.mrf.mxu3  ;;  %v1489_v16 = vadd.f32 %v1488_v21, %v4104_v39  ;;  %v1912_v39 = vld [vmem:[#allocation2 + $0x8] sm:$0xff] }
 0x320   : > { %v1665_v24 = vadd.f32 %v1664_v12, %v1576_v8  ;;  %v1922_v12 = vld [vmem:[#allocation2 + $0xa8] sm:$0xff] }
 0x321   : > { %v1999_v1 = vpop.f32.mrf.mxu0 }
 0x322   : > { %v1894_v44 = vmul.f32 %v1849_v14, %v1665_v24  ;;  %v2071_v15 = vadd.f32 %v1999_v1, %v1910_v13  ;;  %v1923_v24 = vld [vmem:[#allocation2 + $0xd0] sm:$0xff] }
 0x324   : > { %2103 = vst [vmem:[#allocation2 + $0x60] sm:$0xff] %v2071_v15  ;;  %2046 = vmatmul.f32.gmra.mxu0 %v1894_v44  ;;  %v1577_v56 = vpop.f32.mrf.mxu2  ;;  %v1924_v44 = vld [vmem:[#allocation2 + $0x10] sm:$0xff] }
 0x325   : > { %v1578_v17 = vadd.f32 %v1577_v56, %v1489_v16  ;;  %v1925_v56 = vld [vmem:[#allocation2 + $0x28] sm:$0xff] }
 0x326   : > { %v1491_v29 = vpop.f32.mrf.mxu1 }
 0x327   : > { %v1666_v18 = vpop.f32.mrf.mxu3  ;;  %v1492_v9 = vadd.f32 %v1491_v29, %v4110_v46  ;;  %v1913_v46 = vld [vmem:[#allocation2 + $0x78] sm:$0xff]  ;;  %v1926_v29 = vld [vmem:[#allocation2 + $0xa0] sm:$0xff] }
 0x328   : > { %v1667_v22 = vadd.f32 %v1666_v18, %v1578_v17 }
 0x329   : > { %v2002_v30 = vpop.f32.mrf.mxu0 }
 0x32a   : > { %v1895_v25 = vmul.f32 %v1854_v23, %v1667_v22  ;;  %v2072_v58 = vadd.f32 %v2002_v30, %v1911_v19  ;;  %v1927_v23 = vld [vmem:[#allocation2 + $0xf8] sm:$0xff] }
 0x32c   : > { %2104 = vst [vmem:[#allocation2 + $0xf0] sm:$0xff] %v2072_v58  ;;  %2049 = vmatmul.f32.gmra.mxu0 %v1895_v25  ;;  %v1580_v26 = vpop.f32.mrf.mxu2  ;;  %v1928_v58 = vld [vmem:[#allocation2 + $0x20] sm:$0xff] }
 0x32d   : > { %v1581_v27 = vadd.f32 %v1580_v26, %v1492_v9 }
 0x32e   : > { %v1493_v34 = vpop.f32.mrf.mxu1 }
 0x32f   : > { %v1669_v31 = vpop.f32.mrf.mxu3  ;;  %v1494_v55 = vadd.f32 %v1493_v34, %v4122_v59 }
 0x330   : > { %v1670_v33 = vadd.f32 %v1669_v31, %v1581_v27  ;;  %v1929_v27 = vld [vmem:[#allocation2 + $0x98] sm:$0xff] }
 0x331   : > { %v2005_v35 = vpop.f32.mrf.mxu0 }
 0x332   : > { %v1896_v36 = vmul.f32 %v1859_v32, %v1670_v33  ;;  %v2073_v37 = vadd.f32 %v2005_v35, %v1912_v39 }
 0x334   : > { %2105 = vst [vmem:[#allocation2 + $0x8] sm:$0xff] %v2073_v37  ;;  %2052 = vmatmul.f32.gmra.mxu0 %v1896_v36  ;;  %v1582_v5 = vpop.f32.mrf.mxu2 }
 0x335   : > { %v1583_v20 = vadd.f32 %v1582_v5, %v1494_v55 }
 0x337   : > { %v1671_v40 = vpop.f32.mrf.mxu3 }
 0x338   : > { %v1672_v41 = vadd.f32 %v1671_v40, %v1583_v20 }
 0x339   : > { %v2008_v42 = vpop.f32.mrf.mxu0 }
 0x33a   : > { %v1897_v45 = vmul.f32 %v1864_v43, %v1672_v41  ;;  %v2074_v48 = vadd.f32 %v2008_v42, %v1913_v46 }
 0x33c   : > { %2106 = vst [vmem:[#allocation2 + $0x78] sm:$0xff] %v2074_v48  ;;  %2055 = vmatmul.f32.gmra.mxu0 %v1897_v45 }
 0x341   : > { %v2011_v51 = vpop.f32.mrf.mxu0 }
 0x342   : > { %v2075_v2 = vadd.f32 %v2011_v51, %v1914_v49 }
 0x344   : > { %2107 = vst [vmem:[#allocation2 + $0x38] sm:$0xff] %v2075_v2 }
 0x349   : > { %v2014_v11 = vpop.f32.mrf.mxu0 }
 0x34a   : > { %v2076_v59 = vadd.f32 %v2014_v11, %v1915_v52 }
 0x34c   : > { %2108 = vst [vmem:[#allocation2 + $0x58] sm:$0xff] %v2076_v59 }
 0x351   : > { %v2017_v53 = vpop.f32.mrf.mxu0 }
 0x352   : > { %v2077_v57 = vadd.f32 %v2017_v53, %v1916_v28 }
 0x354   : > { %2109 = vst [vmem:[#allocation2 + $0x40] sm:$0xff] %v2077_v57 }
 0x359   : > { %v2020_v60 = vpop.f32.mrf.mxu0 }
 0x35a   : > { %v2078_v61 = vadd.f32 %v2020_v60, %v1917_v47 }
 0x35c   : > { %2110 = vst [vmem:[#allocation2 + $0xc8] sm:$0xff] %v2078_v61 }
 0x361   : > { %v2023_v63 = vpop.f32.mrf.mxu0 }
 0x362   : > { %v2079_v10 = vadd.f32 %v2023_v63, %v1918_v62 }
 0x364   : > { %2111 = vst [vmem:[#allocation2 + $0xe0] sm:$0xff] %v2079_v10 }
 0x369   : > { %v2026_v3 = vpop.f32.mrf.mxu0 }
 0x36a   : > { %v2080_v54 = vadd.f32 %v2026_v3, %v1919_v0 }
 0x36c   : > { %2112 = vst [vmem:[#allocation2 + $0x90] sm:$0xff] %v2080_v54 }
 0x371   : > { %v2029_v4 = vpop.f32.mrf.mxu0 }
 0x372   : > { %v2081_v50 = vadd.f32 %v2029_v4, %v1920_v38 }
 0x374   : > { %2113 = vst [vmem:[#allocation2 + $0x70] sm:$0xff] %v2081_v50 }
 0x379   : > { %v2032_v7 = vpop.f32.mrf.mxu0 }
 0x37a   : > { %v2082_v8 = vadd.f32 %v2032_v7, %v1921_v6 }
 0x37c   : > { %2114 = vst [vmem:[#allocation2 + $0xc0] sm:$0xff] %v2082_v8 }
 0x381   : > { %v2035_v21 = vpop.f32.mrf.mxu0 }
 0x382   : > { %v2083_v13 = vadd.f32 %v2035_v21, %v1922_v12 }
 0x384   : > { %2115 = vst [vmem:[#allocation2 + $0xa8] sm:$0xff] %v2083_v13 }
 0x389   : > { %v2038_v14 = vpop.f32.mrf.mxu0 }
 0x38a   : > { %v2084_v1 = vadd.f32 %v2038_v14, %v1923_v24 }
 0x38c   : > { %2116 = vst [vmem:[#allocation2 + $0xd0] sm:$0xff] %v2084_v1 }
 0x391   : > { %v2041_v15 = vpop.f32.mrf.mxu0 }
 0x392   : > { %v2085_v16 = vadd.f32 %v2041_v15, %v1924_v44 }
 0x394   : > { %2117 = vst [vmem:[#allocation2 + $0x10] sm:$0xff] %v2085_v16 }
 0x399   : > { %v2044_v17 = vpop.f32.mrf.mxu0 }
 0x39a   : > { %v2086_v18 = vadd.f32 %v2044_v17, %v1925_v56 }
 0x39c   : > { %2118 = vst [vmem:[#allocation2 + $0x28] sm:$0xff] %v2086_v18 }
 0x3a1   : > { %v2047_v19 = vpop.f32.mrf.mxu0 }
 0x3a2   : > { %v2087_v22 = vadd.f32 %v2047_v19, %v1926_v29 }
 0x3a4   : > { %2119 = vst [vmem:[#allocation2 + $0xa0] sm:$0xff] %v2087_v22 }
 0x3a9   : > { %v2050_v30 = vpop.f32.mrf.mxu0 }
 0x3aa   : > { %v2088_v25 = vadd.f32 %v2050_v30, %v1927_v23 }
 0x3ac   : > { %2120 = vst [vmem:[#allocation2 + $0xf8] sm:$0xff] %v2088_v25 }
 0x3b1   : > { %v2053_v9 = vpop.f32.mrf.mxu0 }
 0x3b2   : > { %v2089_v26 = vadd.f32 %v2053_v9, %v1928_v58 }
 0x3b4   : > { %2121 = vst [vmem:[#allocation2 + $0x20] sm:$0xff] %v2089_v26 }
 0x3b8   : > { %2126 = sbr.rel (%p2863_p1) target bundleno = 994 (0x3e2), region = 80 }
 0x3b9   : > { %v2056_v31 = vpop.f32.mrf.mxu0 }
 0x3ba   : > { %v2090_v39 = vadd.f32 %v2056_v31, %v1929_v27 }
 0x3bc   : > { %2122 = vst [vmem:[#allocation2 + $0x98] sm:$0xff] %v2090_v39 }
 0x3bd   : > { %v2127_v32 = vld [vmem:[#allocation2 + $0xb0] sm:$0xff]  ;;  %v4191_v33 = vld [vmem:[#allocation11] ss:$0 sm:$0xff]  ;;  %v2129_v35 = vld [vmem:[#allocation2 + $0xd8] sm:$0xff] }
 0x3be   : > { %v2128_v34 = vld [vmem:[#allocation2] sm:$0xff]  ;;  %v2130_v36 = vld [vmem:[#allocation2 + $0x18] sm:$0xff]  ;;  %v2163_v37 = vadd.f32 %v4191_v33, %v2127_v32  ;;  %v2165_v5 = vadd.f32 %v4191_v33, %v2129_v35  ;;  %v2131_v40 = vld [vmem:[#allocation2 + $0x50] sm:$0xff] }
 0x3bf   : > { %v2164_v55 = vadd.f32 %v4191_v33, %v2128_v34  ;;  %v2166_v20 = vadd.f32 %v4191_v33, %v2130_v36  ;;  %v2132_v46 = vld [vmem:[#allocation2 + $0x68] sm:$0xff]  ;;  %v2133_v41 = vld [vmem:[#allocation2 + $0x30] sm:$0xff]  ;;  %v2167_v43 = vadd.f32 %v4191_v33, %v2131_v40  ;;  %v2135_v48 = vld [vmem:[#allocation2 + $0x80] sm:$0xff] }
 0x3c0   : > { %v2168_v42 = vadd.f32 %v4191_v33, %v2132_v46  ;;  %v2134_v45 = vld [vmem:[#allocation2 + $0x48] sm:$0xff]  ;;  %v2195_v49 = vmax.f32 %v2163_v37, 0.0  ;;  %v2197_v2 = vmax.f32 %v2165_v5, 0.0  ;;  %v2169_v52 = vadd.f32 %v4191_v33, %v2133_v41  ;;  %v2138_v60 = vld [vmem:[#allocation2 + $0xb8] sm:$0xff]  ;;  %v2139_v63 = vld [vmem:[#allocation2 + $0x60] sm:$0xff] }
 0x3c1   : > { %v2196_v51 = vmax.f32 %v2164_v55, 0.0  ;;  %v2136_v11 = vld [vmem:[#allocation2 + $0x88] sm:$0xff]  ;;  %v2198_v59 = vmax.f32 %v2166_v20, 0.0  ;;  %v2170_v28 = vadd.f32 %v4191_v33, %v2134_v45  ;;  %v2199_v57 = vmax.f32 %v2167_v43, 0.0  ;;  %v2140_v3 = vld [vmem:[#allocation2 + $0xf0] sm:$0xff]  ;;  %v2142_v7 = vld [vmem:[#allocation2 + $0x78] sm:$0xff] }
 0x3c2   : > { %v2137_v53 = vld [vmem:[#allocation2 + $0xe8] sm:$0xff]  ;;  %2227 = vst [vmem:[%s3907_s17] sm:$0xff] %v2195_v49  ;;  %v2171_v47 = vadd.f32 %v4191_v33, %v2135_v48  ;;  %v2200_v61 = vmax.f32 %v2168_v42, 0.0  ;;  %v2172_v62 = vadd.f32 %v4191_v33, %v2136_v11  ;;  %v2201_v10 = vmax.f32 %v2169_v52, 0.0  ;;  %v2143_v21 = vld [vmem:[#allocation2 + $0x38] sm:$0xff]  ;;  %v2145_v15 = vld [vmem:[#allocation2 + $0x40] sm:$0xff] }
 0x3c3   : > { %2228 = vst [vmem:[%s3907_s17 + $0x8] sm:$0xff] %v2196_v51  ;;  %v2173_v0 = vadd.f32 %v4191_v33, %v2137_v53  ;;  %v2202_v54 = vmax.f32 %v2170_v28, 0.0  ;;  %v2174_v38 = vadd.f32 %v4191_v33, %v2138_v60  ;;  %v2141_v4 = vld [vmem:[#allocation2 + $0x8] sm:$0xff]  ;;  %v2175_v6 = vadd.f32 %v4191_v33, %v2139_v63  ;;  %v2144_v14 = vld [vmem:[#allocation2 + $0x58] sm:$0xff]  ;;  %v2147_v19 = vld [vmem:[#allocation2 + $0xe0] sm:$0xff] }
 0x3c4   : > { %2229 = vst [vmem:[%s3907_s17 + $0x10] sm:$0xff] %v2197_v2  ;;  %v2203_v50 = vmax.f32 %v2171_v47, 0.0  ;;  %v2204_v8 = vmax.f32 %v2172_v62, 0.0  ;;  %v2176_v12 = vadd.f32 %v4191_v33, %v2140_v3  ;;  %v2177_v24 = vadd.f32 %v4191_v33, %v2141_v4  ;;  %v2146_v17 = vld [vmem:[#allocation2 + $0xc8] sm:$0xff]  ;;  %v2148_v30 = vld [vmem:[#allocation2 + $0x90] sm:$0xff]  ;;  %v2150_v31 = vld [vmem:[#allocation2 + $0xc0] sm:$0xff] }
 0x3c5   : > { %2230 = vst [vmem:[%s3907_s17 + $0x18] sm:$0xff] %v2198_v59  ;;  %v2205_v13 = vmax.f32 %v2173_v0, 0.0  ;;  %v2206_v1 = vmax.f32 %v2174_v38, 0.0  ;;  %v2178_v44 = vadd.f32 %v4191_v33, %v2142_v7  ;;  %v2207_v16 = vmax.f32 %v2175_v6, 0.0  ;;  %v2149_v9 = vld [vmem:[#allocation2 + $0x70] sm:$0xff]  ;;  %v2151_v34 = vld [vmem:[#allocation2 + $0xa8] sm:$0xff] }
 0x3c6   : > { %2231 = vst [vmem:[%s3907_s17 + $0x20] sm:$0xff] %v2199_v57  ;;  %v2179_v56 = vadd.f32 %v4191_v33, %v2143_v21  ;;  %v2208_v18 = vmax.f32 %v2176_v12, 0.0  ;;  %v2180_v29 = vadd.f32 %v4191_v33, %v2144_v14  ;;  %v2209_v22 = vmax.f32 %v2177_v24, 0.0  ;;  %v2152_v37 = vld [vmem:[#allocation2 + $0xd0] sm:$0xff]  ;;  %v2154_v41 = vld [vmem:[#allocation2 + $0x28] sm:$0xff]  ;;  %v2155_v45 = vld [vmem:[#allocation2 + $0xa0] sm:$0xff] }
 0x3c7   : > { %2232 = vst [vmem:[%s3907_s17 + $0x28] sm:$0xff] %v2200_v61  ;;  %v2181_v23 = vadd.f32 %v4191_v33, %v2145_v15  ;;  %v2210_v25 = vmax.f32 %v2178_v44, 0.0  ;;  %v2182_v58 = vadd.f32 %v4191_v33, %v2146_v17  ;;  %v2183_v27 = vadd.f32 %v4191_v33, %v2147_v19  ;;  %v2153_v20 = vld [vmem:[#allocation2 + $0x10] sm:$0xff]  ;;  %v2156_v51 = vld [vmem:[#allocation2 + $0xf8] sm:$0xff]  ;;  %v2157_v11 = vld [vmem:[#allocation2 + $0x20] sm:$0xff] }
 0x3c8   : > { %2233 = vst [vmem:[%s3907_s17 + $0x30] sm:$0xff] %v2201_v10  ;;  %v2211_v26 = vmax.f32 %v2179_v56, 0.0  ;;  %v2212_v39 = vmax.f32 %v2180_v29, 0.0  ;;  %v2184_v32 = vadd.f32 %v4191_v33, %v2148_v30  ;;  %v2185_v36 = vadd.f32 %v4191_v33, %v2149_v9  ;;  %v2158_v53 = vld [vmem:[#allocation2 + $0x98] sm:$0xff] }
 0x3c9   : > { %2234 = vst [vmem:[%s3907_s17 + $0x38] sm:$0xff] %v2202_v54  ;;  %v2213_v35 = vmax.f32 %v2181_v23, 0.0  ;;  %v2214_v55 = vmax.f32 %v2182_v58, 0.0  ;;  %v2186_v5 = vadd.f32 %v4191_v33, %v2150_v31  ;;  %v2215_v40 = vmax.f32 %v2183_v27, 0.0 }
 0x3ca   : > { %2235 = vst [vmem:[%s3907_s17 + $0x40] sm:$0xff] %v2203_v50  ;;  %v2187_v46 = vadd.f32 %v4191_v33, %v2151_v34  ;;  %v2216_v43 = vmax.f32 %v2184_v32, 0.0  ;;  %v2188_v42 = vadd.f32 %v4191_v33, %v2152_v37  ;;  %v2217_v48 = vmax.f32 %v2185_v36, 0.0 }
 0x3cb   : > { %2236 = vst [vmem:[%s3907_s17 + $0x48] sm:$0xff] %v2204_v8  ;;  %v2189_v49 = vadd.f32 %v4191_v33, %v2153_v20  ;;  %v2218_v2 = vmax.f32 %v2186_v5, 0.0  ;;  %v2190_v52 = vadd.f32 %v4191_v33, %v2154_v41  ;;  %v2191_v28 = vadd.f32 %v4191_v33, %v2155_v45 }
 0x3cc   : > { %2237 = vst [vmem:[%s3907_s17 + $0x50] sm:$0xff] %v2205_v13  ;;  %v2219_v59 = vmax.f32 %v2187_v46, 0.0  ;;  %v2220_v57 = vmax.f32 %v2188_v42, 0.0  ;;  %v2192_v47 = vadd.f32 %v4191_v33, %v2156_v51  ;;  %v2193_v61 = vadd.f32 %v4191_v33, %v2157_v11 }
 0x3cd   : > { %2238 = vst [vmem:[%s3907_s17 + $0x58] sm:$0xff] %v2206_v1  ;;  %v2221_v60 = vmax.f32 %v2189_v49, 0.0  ;;  %v2222_v62 = vmax.f32 %v2190_v52, 0.0  ;;  %v2194_v63 = vadd.f32 %v4191_v33, %v2158_v53  ;;  %v2223_v10 = vmax.f32 %v2191_v28, 0.0 }
 0x3ce   : > { %2239 = vst [vmem:[%s3907_s17 + $0x60] sm:$0xff] %v2207_v16  ;;  %v2224_v0 = vmax.f32 %v2192_v47, 0.0  ;;  %v2225_v3 = vmax.f32 %v2193_v61, 0.0 }
 0x3cf   : > { %2240 = vst [vmem:[%s3907_s17 + $0x68] sm:$0xff] %v2208_v18  ;;  %v2226_v54 = vmax.f32 %v2194_v63, 0.0 }
 0x3d0   : > { %2241 = vst [vmem:[%s3907_s17 + $0x70] sm:$0xff] %v2209_v22 }
 0x3d1   : > { %2242 = vst [vmem:[%s3907_s17 + $0x78] sm:$0xff] %v2210_v25 }
 0x3d2   : > { %2243 = vst [vmem:[%s3907_s17 + $0x80] sm:$0xff] %v2211_v26 }
 0x3d3   : > { %2244 = vst [vmem:[%s3907_s17 + $0x88] sm:$0xff] %v2212_v39 }
 0x3d4   : > { %2245 = vst [vmem:[%s3907_s17 + $0x90] sm:$0xff] %v2213_v35 }
 0x3d5   : > { %2246 = vst [vmem:[%s3907_s17 + $0x98] sm:$0xff] %v2214_v55 }
 0x3d6   : > { %2247 = vst [vmem:[%s3907_s17 + $0xa0] sm:$0xff] %v2215_v40 }
 0x3d7   : > { %2248 = vst [vmem:[%s3907_s17 + $0xa8] sm:$0xff] %v2216_v43 }
 0x3d8   : > { %2249 = vst [vmem:[%s3907_s17 + $0xb0] sm:$0xff] %v2217_v48 }
 0x3d9   : > { %2250 = vst [vmem:[%s3907_s17 + $0xb8] sm:$0xff] %v2218_v2 }
 0x3da   : > { %2251 = vst [vmem:[%s3907_s17 + $0xc0] sm:$0xff] %v2219_v59 }
 0x3db   : > { %2252 = vst [vmem:[%s3907_s17 + $0xc8] sm:$0xff] %v2220_v57 }
 0x3dc   : > { %2253 = vst [vmem:[%s3907_s17 + $0xd0] sm:$0xff] %v2221_v60 }
 0x3dd   : > { %2254 = vst [vmem:[%s3907_s17 + $0xd8] sm:$0xff] %v2222_v62 }
 0x3de   : > { %2255 = vst [vmem:[%s3907_s17 + $0xe0] sm:$0xff] %v2223_v10 }
 0x3df   : > { %2256 = vst [vmem:[%s3907_s17 + $0xe8] sm:$0xff] %v2224_v0 }
 0x3e0   : > { %2257 = vst [vmem:[%s3907_s17 + $0xf0] sm:$0xff] %v2225_v3 }
 0x3e1   : > { %2258 = vst [vmem:[%s3907_s17 + $0xf8] sm:$0xff] %v2226_v54 }
 0x3e2 PF: > { %s4382_s25 = sld [smem:[#allocation24_spill]]  ;;  %s2272_s3 = sshll.u32 %s3907_s17, 4  ;;  %s2273_s3 = int_to_ptr.vmem [resolvable:$true] %s2272_s3 }
 0x3e3   : > { %s4384_s10 = sld [smem:[#allocation35_spill]]  ;;  %s2260_s27 = scalar_lea.sflag [#allocation5], %s405_s6 }
 0x3e8   : > { %s2968_s0 = sshll.u32 %s4382_s25, 8 }
 0x3e9   : > { %s4385_s18 = smov %s4384_s10  ;;  %s2271_s30 = scalar_lea.hbm %s4384_s10, %s2968_s0 }
 0x3ea   : > { %s2274_s15 = sshll.u32 %s2271_s30, 4  ;;  %s3421_s12 = scalar_lea.hbm %s4385_s18, 512  ;;  %s2275_s15 = int_to_ptr.hbm [resolvable:$true] %s2274_s15 }
 0x3eb   : > { %s3415_s5 = sshra.s32 %s2275_s15, 4  ;;  %s3416_s5 = int_to_ptr.hbm [resolvable:$true] %s3415_s5 }
 0x3ec   : > { %s3417_s16 = scalar_lea.hbm %s3416_s5, 256  ;;  %p3422_p9 = scmp.lt.s32.totalorder %s3416_s5, %s4385_s18 }
 0x3ed   : > { %p3418_p3 = scmp.ne.s32.totalorder %s3416_s5, %s3417_s16  ;;  %p3423_p10 = scmp.lt.s32.totalorder %s3421_s12, %s3417_s16 }
 0x3ef   : > { %p3419_p0 = pnand %p3418_p3, %p3834_p13  ;;  %p3424_p5 = por %p3423_p10, %p3422_p9 }
 0x3f1   : > { %p3420_p4 = pneg %p3419_p0 }
 0x3f3   : > { %p3425_p6 = pnand %p3424_p5, %p3420_p4 }
 0x3f5   : > { %3428 = shalt.err (!%p3425_p6)
}
 0x3f6   : > { %s3579_s6 = smov 128   ;;  %s3580_s17 = smov 8  }
 0x3f7   : > { %3059 = dma.vmem_to_hbm [thread:$0]  (%p3834_p13), %s2273_s3, 4096, %s2275_s15, %s2260_s27, %s3579_s6, %s3579_s6, %s3580_s17  }
 0x3f8 PF: > { %s4386_s24 = sld [smem:[#allocation21_spill]]  ;;  %p3092_p2 = scmp.ge.s32.totalorder %s3567_s14, 2 }
 0x3fa   : > { %p3082_p7 = pnand %p3092_p2, %p3845_p8 }
 0x3fc   : > { %p3083_p12 = pneg %p3082_p7 }
 0x3fe   : > { %s2289_s0 = sand.u32 1, %s4386_s24  }
 0x3ff   : > { %s2290_s11 = scalar_lea.sflag [#allocation5], %s2289_s0 }
 0x400   : > { %3510 = dma.done.wait (%p3083_p12), %s2290_s11, 4096  }
 0x401   : > { %3512 = vsyncadd (%p3083_p12), %s2290_s11, 4294963200  ;;  %s25_s14 = sadd.s32 1, %s3567_s14   ;;  %s4388_s24 = sld [smem:[#allocation22_spill]] }
 0x402   : > { %p4279_p11 = scmp.ge.s32.totalorder %s25_s14, 8   ;;  %s4389_s10 = sld [smem:[#allocation25_spill]] }
 0x403   : > { %s4390_s12 = sld [smem:[#allocation26_spill]]  ;;  %s4392_s25 = smov %s3523_s26 }
 0x404   : > { %s4391_s1 = sld [smem:[#allocation27_spill]]  ;;  %s4393_s26 = smov %s3822_s20 }
 0x405   : > { %s4394_s27 = smov %s3531_s28  ;;  %s4395_s28 = smov %s3535_s29 }
 0x406   : > { %s4396_s29 = smov %s3777_s7  ;;  %s4397_s30 = smov %s3543_s8 }
 0x407   : > { %s4398_s8 = smov %s3547_s9  ;;  %s4399_s9 = smov %s3727_s2 }
 0x408   : > { %s4400_s11 = smov %s3563_s13  ;;  %24 = sbr.rel (!%p4279_p11) target bundleno = 21 (0x15), region = 138 }
 0x40a   : > { %s4401_s13 = smov %s4391_s1 }
 0x40d   :  { %2296 = vsyncpa [#allocation4], 1 }
 0x40e   :  { %2298 = vsyncpa [#allocation4 + $0x1], 1 }
 0x40f   :  { %2299 = vsyncpa [#allocation7], 1 }
 0x410   :  { %2300 = vsyncpa [#allocation12], 1 }
 0x411   :  { %2301 = vsyncpa [#allocation5], 1 }
 0x412   :  { %2303 = vsyncpa [#allocation5 + $0x1], 1 }

</bundles_post_ra>
